<compile_context>
chip_gen: v6e
topology: v6e:2x2x1
jax: 0.10.0
libtpu: 0.0.40
codegen_flags: <defaults>
</compile_context>

<pallas_src>
import math

import jax
import jax.numpy as jnp
from jax import lax
from jax.experimental import pallas as pl
from jax.experimental.pallas import tpu as pltpu


def _round_up(x, m):
    return ((x + m - 1) // m) * m


# ----------------------------------------------------------------------------
# Fused kernel.  PyTorch GRU gate math (gate order r, z, n):
#   gi = x @ W_ih^T + b_ih (+ folded b_hr, b_hz)     (one GEMM per layer, all T)
#   gh = h @ W_hh^T (+ b_hn on the n block)
#   r = sigmoid(gi_r + gh_r); z = sigmoid(gi_z + gh_z)
#   n = tanh(gi_n + r * gh_n);  h' = (1 - z) * n + z * h  ==  n + z * (h - n)
#
# Packed lane layout (Lp = 128 lanes): [ r | z | n | z_dup ] blocks of H lanes.
# The hidden state h lives in the n block (lanes 2H:3H); all other lanes carry
# bounded garbage that never reaches a non-zero weight row, so numerics equal
# the unpadded model exactly.
# ----------------------------------------------------------------------------
def _make_gru_kernel(num_layers, seq_len, batch_tile, hidden_dim, lanes):
    T, BT, H, Lp = seq_len, batch_tile, hidden_dim, lanes
    unroll = True if T <= 16 else 8

    def kernel(*refs):
        base = 1 + 4 * num_layers
        x_ref = refs[0]                      # (T*BT, D_in)   time-major, flat
        layer_refs = refs[1:base]            # 4 refs per layer
        fc_w_ref = refs[base]                # (Lp, O)
        fc_b_ref = refs[base + 1]            # (1, O)
        out_ref = refs[base + 2]             # (BT, O)
        gi_ref = refs[base + 3]              # (T*BT, Lp) scratch (input gates)
        seq_ref = refs[base + 4]             # (T*BT, Lp) scratch (layer l -> l+1)

        h_last = None
        for layer in range(num_layers):
            w_ih_ref, w_hh_ref, b_comb_ref, b_hn_ref = (
                layer_refs[4 * layer:4 * layer + 4])

            # Phase 1: hoisted input projection — one lane-dense GEMM covering
            # every timestep of this layer (r/z hidden biases already folded).
            x_all = x_ref[...] if layer == 0 else seq_ref[...]
            gi_ref[...] = (
                jnp.dot(x_all, w_ih_ref[...], preferred_element_type=jnp.float32)
                + b_comb_ref[...])

            # Phase 2: serial recurrence — only h @ W_hh (single 128x128 tile)
            # per timestep.  Weight load and b_hn broadcast hoisted.
            w_hh = w_hh_ref[...]                               # (Lp, Lp)
            b_hn = jnp.broadcast_to(b_hn_ref[...], (BT, Lp))   # n block only
            write_seq = layer < num_layers - 1

            def step(t, h, w_hh=w_hh, b_hn=b_hn, write_seq=write_seq):
                row = pl.multiple_of(t * BT, BT)           # sublane-tile aligned
                gi = gi_ref[pl.ds(row, BT), :]             # (BT, Lp)
                gh = jnp.dot(h, w_hh, preferred_element_type=jnp.float32) + b_hn
                sig = jax.nn.sigmoid(gi + gh)              # [ r | z | * | z ]
                # Bring r and z to the n block (XLU rolls; only the r-roll is
                # on the critical path of the tanh).  The z_dup block makes
                # both rolls robust to rotate-direction conventions for H=32.
                r_al = pltpu.roll(sig, shift=2 * H, axis=1)
                z_al = pltpu.roll(sig, shift=H, axis=1)
                n_gate = jnp.tanh(gi + r_al * gh)          # valid at n block
                h_new = n_gate + z_al * (h - n_gate)       # == (1-z)*n + z*h
                if write_seq:                              # static per layer
                    seq_ref[pl.ds(row, BT), :] = h_new
                return h_new

            h0 = jnp.zeros((BT, Lp), jnp.float32)          # zero h0 per layer
            h_last = lax.fori_loop(0, T, step, h0, unroll=unroll)

        # Fused final Linear on the last timestep's hidden state only.
        out_ref[...] = (
            jnp.dot(h_last, fc_w_ref[...], preferred_element_type=jnp.float32)
            + fc_b_ref[...]).astype(out_ref.dtype)

    return kernel


# ----------------------------------------------------------------------------
# Parameter construction: PyTorch nn.GRU / nn.Linear init, repacked into the
# single 128-lane gate tile [ r | z | n | z_dup ].  Only rows 2H:3H of the
# hidden-side / inter-layer / fc matrices are non-zero, so garbage lanes of the
# state never reach a non-zero weight and numerics match hidden_dim=32 exactly.
# b_hh_r / b_hh_z are folded into the combined input-side bias; b_hn stays
# separate (it is multiplied by r).
# ----------------------------------------------------------------------------
def init_params(key, input_dim, hidden_dim, num_layers, output_dim):
    H = hidden_dim
    assert 3 * H <= 128, "packed-gate kernel assumes 3*hidden_dim <= 128"
    Lp = 128
    dup = 4 * H <= Lp          # spare block -> duplicate z columns
    bound = 1.0 / math.sqrt(H)

    col_blocks = [0, 1, 2] + ([3] if dup else [])   # destination lane blocks
    src_gates = [0, 1, 2] + ([1] if dup else [])    # PyTorch gate order r,z,n

    layers = []
    for layer in range(num_layers):
        d_in = input_dim if layer == 0 else H
        row_off = 0 if layer == 0 else 2 * H        # layer>=1 input = prev h (n block)
        rows_in = input_dim if layer == 0 else Lp

        key, k1, k2, k3, k4 = jax.random.split(key, 5)
        w_ih = jax.random.uniform(k1, (3 * H, d_in),
                                  minval=-bound, maxval=bound, dtype=jnp.float32)
        w_hh = jax.random.uniform(k2, (3 * H, H),
                                  minval=-bound, maxval=bound, dtype=jnp.float32)
        b_ih = jax.random.uniform(k3, (3 * H,),
                                  minval=-bound, maxval=bound, dtype=jnp.float32)
        b_hh = jax.random.uniform(k4, (3 * H,),
                                  minval=-bound, maxval=bound, dtype=jnp.float32)

        w_ih_p = jnp.zeros((rows_in, Lp), jnp.float32)
        w_hh_p = jnp.zeros((Lp, Lp), jnp.float32)
        b_comb = jnp.zeros((1, Lp), jnp.float32)
        b_hn_p = jnp.zeros((1, Lp), jnp.float32)

        for cb, g in zip(col_blocks, src_gates):
            c0 = cb * H
            w_ih_p = w_ih_p.at[row_off:row_off + d_in, c0:c0 + H].set(
                w_ih[g * H:(g + 1) * H, :].T)
            w_hh_p = w_hh_p.at[2 * H:3 * H, c0:c0 + H].set(
                w_hh[g * H:(g + 1) * H, :].T)
            if g == 2:                               # n gate
                b_comb = b_comb.at[0, c0:c0 + H].set(b_ih[g * H:(g + 1) * H])
                b_hn_p = b_hn_p.at[0, c0:c0 + H].set(b_hh[g * H:(g + 1) * H])
            else:                                    # r / z: fold b_hh into b_ih
                b_comb = b_comb.at[0, c0:c0 + H].set(
                    b_ih[g * H:(g + 1) * H] + b_hh[g * H:(g + 1) * H])
        layers.append((w_ih_p, w_hh_p, b_comb, b_hn_p))

    key, kf1, kf2 = jax.random.split(key, 3)
    fb = 1.0 / math.sqrt(H)
    fc_w = jax.random.uniform(kf1, (output_dim, H),
                              minval=-fb, maxval=fb, dtype=jnp.float32)
    fc_b = jax.random.uniform(kf2, (output_dim,),
                              minval=-fb, maxval=fb, dtype=jnp.float32)
    fc_w_p = jnp.zeros((Lp, output_dim), jnp.float32).at[2 * H:3 * H, :].set(fc_w.T)
    fc_b_p = fc_b.reshape(1, output_dim)

    return {"layers": layers, "fc_w_p": fc_w_p, "fc_b": fc_b_p,
            "lanes": Lp, "hidden_dim": H, "output_dim": output_dim}


# ----------------------------------------------------------------------------
# Wrapper: batch_first (B, T, D) -> (B, output_dim)
# ----------------------------------------------------------------------------
def gru_model_forward(x, params):
    """x: (B, T, input_dim), batch_first like the PyTorch module."""
    B, T, D = x.shape
    Lp = params["lanes"]
    H = params["hidden_dim"]
    O = params["output_dim"]
    layers = params["layers"]
    num_layers = len(layers)

    BT = 8                                   # sublane tile rows per batch tile
    Bp = _round_up(B, BT)
    n_bt = Bp // BT

    # Host-side layout prep: time-major, batch padded to full sublane tiles,
    # then grouped into (n_bt, T*BT, D) so each grid step owns one lane/sublane
    # aligned batch tile and every in-kernel matmul is a plain 2-D GEMM.
    x_tm = jnp.transpose(x, (1, 0, 2))                        # (T, B, D)
    x_tm = jnp.pad(x_tm, ((0, 0), (0, Bp - B), (0, 0)))       # (T, Bp, D)
    x_tiles = (x_tm.reshape(T, n_bt, BT, D)
               .transpose(1, 0, 2, 3)
               .reshape(n_bt, T * BT, D))                     # (n_bt, T*BT, D)

    flat_args = [x_tiles]
    for lp in layers:
        flat_args.extend(lp)
    flat_args.append(params["fc_w_p"])
    flat_args.append(params["fc_b"])

    # Explicit specs: weights/biases get full-array blocks with constant index
    # maps -> DMA'd once, VMEM-resident across the whole grid.
    def const_spec(arr):
        return pl.BlockSpec(arr.shape, lambda b: (0,) * arr.ndim)

    in_specs = [pl.BlockSpec((None, T * BT, D), lambda b: (b, 0, 0))]
    in_specs += [const_spec(a) for a in flat_args[1:]]
    out_spec = pl.BlockSpec((None, BT, O), lambda b: (b, 0, 0))

    kernel = _make_gru_kernel(num_layers, T, BT, H, Lp)
    out = pl.pallas_call(
        kernel,
        grid=(n_bt,),                                   # batch tiles: parallel
        out_shape=jax.ShapeDtypeStruct((n_bt, BT, O), jnp.float32),
        in_specs=in_specs,
        out_specs=out_spec,
        scratch_shapes=[
            pltpu.VMEM((T * BT, Lp), jnp.float32),      # precomputed input gates
            pltpu.VMEM((T * BT, Lp), jnp.float32),      # inter-layer sequence
        ],
        compiler_params=pltpu.CompilerParams(
            dimension_semantics=("parallel",),
            vmem_limit_bytes=32 * 1024 * 1024),
    )(*flat_args)
    return out.reshape(Bp, O)[:B]


if __name__ == "__main__":
    # Small shapes consistent with the module's forward
    batch, seq_len, input_dim = 2, 8, 4
    hidden_dim, num_layers, output_dim = 32, 2, 1
    dropout_prob = 0.1  # unused at inference (nn.GRU dropout is training-only)

    key = jax.random.PRNGKey(0)
    key, kx = jax.random.split(key)
    x = jax.random.normal(kx, (batch, seq_len, input_dim), dtype=jnp.float32)

    params = init_params(key, input_dim, hidden_dim, num_layers, output_dim)

    @jax.jit
    def fwd(x_in):
        return gru_model_forward(x_in, params)

    out = fwd(x)
    jax.block_until_ready(out)
    assert out.shape == (batch, output_dim)
    print("KERNEL_OK")
</pallas_src>

<mosaic_0001>
module attributes {stable_mosaic.version = 11 : i64} {
  func.func @kernel(%arg0: i32, %arg1: memref<1x64x4xf32, #tpu.memory_space<vmem>>, %arg2: memref<4x128xf32, #tpu.memory_space<vmem>>, %arg3: memref<128x128xf32, #tpu.memory_space<vmem>>, %arg4: memref<1x128xf32, #tpu.memory_space<vmem>>, %arg5: memref<1x128xf32, #tpu.memory_space<vmem>>, %arg6: memref<128x128xf32, #tpu.memory_space<vmem>>, %arg7: memref<128x128xf32, #tpu.memory_space<vmem>>, %arg8: memref<1x128xf32, #tpu.memory_space<vmem>>, %arg9: memref<1x128xf32, #tpu.memory_space<vmem>>, %arg10: memref<128x1xf32, #tpu.memory_space<vmem>>, %arg11: memref<1x1xf32, #tpu.memory_space<vmem>>, %arg12: memref<1x8x1xf32, #tpu.memory_space<vmem>>, %arg13: memref<64x128xf32, #tpu.memory_space<vmem>>, %arg14: memref<64x128xf32, #tpu.memory_space<vmem>>) attributes {dimension_semantics = [#tpu.dimension_semantics<parallel>], iteration_bounds = array<i64: 1>, scalar_prefetch = 0 : i64, scratch_operands = 2 : i64, tpu.core_type = #tpu.core_type<tc>, window_params = [{transform_indices = @transform_0, window_bounds = array<i64: 1, 64, 4>}, {pipeline_mode = #tpu.pipeline_mode<synchronous>, transform_indices = @transform_1, window_bounds = array<i64: 4, 128>}, {pipeline_mode = #tpu.pipeline_mode<synchronous>, transform_indices = @transform_2, window_bounds = array<i64: 128, 128>}, {pipeline_mode = #tpu.pipeline_mode<synchronous>, transform_indices = @transform_3, window_bounds = array<i64: 1, 128>}, {pipeline_mode = #tpu.pipeline_mode<synchronous>, transform_indices = @transform_4, window_bounds = array<i64: 1, 128>}, {pipeline_mode = #tpu.pipeline_mode<synchronous>, transform_indices = @transform_5, window_bounds = array<i64: 128, 128>}, {pipeline_mode = #tpu.pipeline_mode<synchronous>, transform_indices = @transform_6, window_bounds = array<i64: 128, 128>}, {pipeline_mode = #tpu.pipeline_mode<synchronous>, transform_indices = @transform_7, window_bounds = array<i64: 1, 128>}, {pipeline_mode = #tpu.pipeline_mode<synchronous>, transform_indices = @transform_8, window_bounds = array<i64: 1, 128>}, {pipeline_mode = #tpu.pipeline_mode<synchronous>, transform_indices = @transform_9, window_bounds = array<i64: 128, 1>}, {pipeline_mode = #tpu.pipeline_mode<synchronous>, transform_indices = @transform_10, window_bounds = array<i64: 1, 1>}, {transform_indices = @transform_11, window_bounds = array<i64: 1, 8, 1>}]} {
    %c0 = arith.constant 0 : index
    %c0_0 = arith.constant 0 : index
    %c0_1 = arith.constant 0 : index
    %0 = vector.load %arg1[%c0, %c0_0, %c0_1] : memref<1x64x4xf32, #tpu.memory_space<vmem>>, vector<1x64x4xf32>
    %1 = vector.shape_cast %0 : vector<1x64x4xf32> to vector<64x4xf32>
    %c0_2 = arith.constant 0 : index
    %c0_3 = arith.constant 0 : index
    %2 = vector.load %arg2[%c0_2, %c0_3] : memref<4x128xf32, #tpu.memory_space<vmem>>, vector<4x128xf32>
    %cst = arith.constant dense<0.000000e+00> : vector<64x128xf32>
    %3 = tpu.matmul %1, %2, %cst {dimension_numbers = #tpu.dot_dimension_numbers<[1], [0], [0], [1], [0, 0, 1, 1], [], []>} : vector<64x4xf32>, vector<4x128xf32>, vector<64x128xf32> -> vector<64x128xf32>
    %c0_4 = arith.constant 0 : index
    %c0_5 = arith.constant 0 : index
    %4 = vector.load %arg4[%c0_4, %c0_5] : memref<1x128xf32, #tpu.memory_space<vmem>>, vector<1x128xf32>
    %5 = vector.broadcast %4 : vector<1x128xf32> to vector<64x128xf32>
    %6 = arith.addf %3, %5 : vector<64x128xf32>
    %c0_6 = arith.constant 0 : index
    %c0_7 = arith.constant 0 : index
    %7 = vector.load %arg13[%c0_6, %c0_7] : memref<64x128xf32, #tpu.memory_space<vmem>>, vector<64x128xf32>
    tpu.vector_store %arg13[%c0_6, %c0_7], %6 {strides = array<i32>} : memref<64x128xf32, #tpu.memory_space<vmem>>, vector<64x128xf32>,
    %c0_8 = arith.constant 0 : index
    %c0_9 = arith.constant 0 : index
    %8 = vector.load %arg3[%c0_8, %c0_9] : memref<128x128xf32, #tpu.memory_space<vmem>>, vector<128x128xf32>
    %c0_10 = arith.constant 0 : index
    %c0_11 = arith.constant 0 : index
    %9 = vector.load %arg5[%c0_10, %c0_11] : memref<1x128xf32, #tpu.memory_space<vmem>>, vector<1x128xf32>
    %10 = vector.shape_cast %9 : vector<1x128xf32> to vector<1x128xf32>
    %11 = vector.broadcast %10 : vector<1x128xf32> to vector<8x128xf32>
    %cst_12 = arith.constant 0.000000e+00 : f32
    %12 = vector.broadcast %cst_12 : f32 to vector<8x128xf32>
    %c0_i32 = arith.constant 0 : i32
    %c8_i32 = arith.constant 8 : i32
    %13 = arith.muli %c0_i32, %c8_i32 : i32
    %14 = tpu.assume_multiple %13, 8 : i32
    %15 = arith.index_cast %14 : i32 to index
    %c0_13 = arith.constant 0 : index
    %16 = vector.load %arg13[%15, %c0_13] : memref<64x128xf32, #tpu.memory_space<vmem>>, vector<8x128xf32>
    %cst_14 = arith.constant dense<0.000000e+00> : vector<8x128xf32>
    %17 = tpu.matmul %12, %8, %cst_14 {dimension_numbers = #tpu.dot_dimension_numbers<[1], [0], [0], [1], [0, 0, 1, 1], [], []>} : vector<8x128xf32>, vector<128x128xf32>, vector<8x128xf32> -> vector<8x128xf32>
    %18 = arith.addf %17, %11 : vector<8x128xf32>
    %19 = arith.addf %16, %18 : vector<8x128xf32>
    %20 = arith.negf %19 : vector<8x128xf32>
    %21 = math.exp %20 : vector<8x128xf32>
    %cst_15 = arith.constant 1.000000e+00 : f32
    %22 = vector.broadcast %cst_15 : f32 to vector<8x128xf32>
    %23 = arith.addf %22, %21 : vector<8x128xf32>
    %24 = arith.divf %22, %23 : vector<8x128xf32>
    %c64_i32 = arith.constant 64 : i32
    %25 = tpu.dynamic_rotate %24 by %c64_i32 dim 1 : vector<8x128xf32>, i32 -> vector<8x128xf32>
    %c32_i32 = arith.constant 32 : i32
    %26 = tpu.dynamic_rotate %24 by %c32_i32 dim 1 : vector<8x128xf32>, i32 -> vector<8x128xf32>
    %27 = arith.mulf %25, %18 : vector<8x128xf32>
    %28 = arith.addf %16, %27 : vector<8x128xf32>
    %29 = math.tanh %28 : vector<8x128xf32>
    %30 = arith.subf %12, %29 : vector<8x128xf32>
    %31 = arith.mulf %26, %30 : vector<8x128xf32>
    %32 = arith.addf %29, %31 : vector<8x128xf32>
    %33 = arith.index_cast %14 : i32 to index
    %c0_16 = arith.constant 0 : index
    %34 = vector.load %arg14[%33, %c0_16] : memref<64x128xf32, #tpu.memory_space<vmem>>, vector<8x128xf32>
    tpu.vector_store %arg14[%33, %c0_16], %32 {strides = array<i32>} : memref<64x128xf32, #tpu.memory_space<vmem>>, vector<8x128xf32>,
    %c1_i32 = arith.constant 1 : i32
    %c8_i32_17 = arith.constant 8 : i32
    %35 = arith.muli %c1_i32, %c8_i32_17 : i32
    %36 = tpu.assume_multiple %35, 8 : i32
    %37 = arith.index_cast %36 : i32 to index
    %c0_18 = arith.constant 0 : index
    %38 = vector.load %arg13[%37, %c0_18] : memref<64x128xf32, #tpu.memory_space<vmem>>, vector<8x128xf32>
    %cst_19 = arith.constant dense<0.000000e+00> : vector<8x128xf32>
    %39 = tpu.matmul %32, %8, %cst_19 {dimension_numbers = #tpu.dot_dimension_numbers<[1], [0], [0], [1], [0, 0, 1, 1], [], []>} : vector<8x128xf32>, vector<128x128xf32>, vector<8x128xf32> -> vector<8x128xf32>
    %40 = arith.addf %39, %11 : vector<8x128xf32>
    %41 = arith.addf %38, %40 : vector<8x128xf32>
    %42 = arith.negf %41 : vector<8x128xf32>
    %43 = math.exp %42 : vector<8x128xf32>
    %cst_20 = arith.constant 1.000000e+00 : f32
    %44 = vector.broadcast %cst_20 : f32 to vector<8x128xf32>
    %45 = arith.addf %44, %43 : vector<8x128xf32>
    %46 = arith.divf %44, %45 : vector<8x128xf32>
    %c64_i32_21 = arith.constant 64 : i32
    %47 = tpu.dynamic_rotate %46 by %c64_i32_21 dim 1 : vector<8x128xf32>, i32 -> vector<8x128xf32>
    %c32_i32_22 = arith.constant 32 : i32
    %48 = tpu.dynamic_rotate %46 by %c32_i32_22 dim 1 : vector<8x128xf32>, i32 -> vector<8x128xf32>
    %49 = arith.mulf %47, %40 : vector<8x128xf32>
    %50 = arith.addf %38, %49 : vector<8x128xf32>
    %51 = math.tanh %50 : vector<8x128xf32>
    %52 = arith.subf %32, %51 : vector<8x128xf32>
    %53 = arith.mulf %48, %52 : vector<8x128xf32>
    %54 = arith.addf %51, %53 : vector<8x128xf32>
    %55 = arith.index_cast %36 : i32 to index
    %c0_23 = arith.constant 0 : index
    %56 = vector.load %arg14[%55, %c0_23] : memref<64x128xf32, #tpu.memory_space<vmem>>, vector<8x128xf32>
    tpu.vector_store %arg14[%55, %c0_23], %54 {strides = array<i32>} : memref<64x128xf32, #tpu.memory_space<vmem>>, vector<8x128xf32>,
    %c2_i32 = arith.constant 2 : i32
    %c8_i32_24 = arith.constant 8 : i32
    %57 = arith.muli %c2_i32, %c8_i32_24 : i32
    %58 = tpu.assume_multiple %57, 8 : i32
    %59 = arith.index_cast %58 : i32 to index
    %c0_25 = arith.constant 0 : index
    %60 = vector.load %arg13[%59, %c0_25] : memref<64x128xf32, #tpu.memory_space<vmem>>, vector<8x128xf32>
    %cst_26 = arith.constant dense<0.000000e+00> : vector<8x128xf32>
    %61 = tpu.matmul %54, %8, %cst_26 {dimension_numbers = #tpu.dot_dimension_numbers<[1], [0], [0], [1], [0, 0, 1, 1], [], []>} : vector<8x128xf32>, vector<128x128xf32>, vector<8x128xf32> -> vector<8x128xf32>
    %62 = arith.addf %61, %11 : vector<8x128xf32>
    %63 = arith.addf %60, %62 : vector<8x128xf32>
    %64 = arith.negf %63 : vector<8x128xf32>
    %65 = math.exp %64 : vector<8x128xf32>
    %cst_27 = arith.constant 1.000000e+00 : f32
    %66 = vector.broadcast %cst_27 : f32 to vector<8x128xf32>
    %67 = arith.addf %66, %65 : vector<8x128xf32>
    %68 = arith.divf %66, %67 : vector<8x128xf32>
    %c64_i32_28 = arith.constant 64 : i32
    %69 = tpu.dynamic_rotate %68 by %c64_i32_28 dim 1 : vector<8x128xf32>, i32 -> vector<8x128xf32>
    %c32_i32_29 = arith.constant 32 : i32
    %70 = tpu.dynamic_rotate %68 by %c32_i32_29 dim 1 : vector<8x128xf32>, i32 -> vector<8x128xf32>
    %71 = arith.mulf %69, %62 : vector<8x128xf32>
    %72 = arith.addf %60, %71 : vector<8x128xf32>
    %73 = math.tanh %72 : vector<8x128xf32>
    %74 = arith.subf %54, %73 : vector<8x128xf32>
    %75 = arith.mulf %70, %74 : vector<8x128xf32>
    %76 = arith.addf %73, %75 : vector<8x128xf32>
    %77 = arith.index_cast %58 : i32 to index
    %c0_30 = arith.constant 0 : index
    %78 = vector.load %arg14[%77, %c0_30] : memref<64x128xf32, #tpu.memory_space<vmem>>, vector<8x128xf32>
    tpu.vector_store %arg14[%77, %c0_30], %76 {strides = array<i32>} : memref<64x128xf32, #tpu.memory_space<vmem>>, vector<8x128xf32>,
    %c3_i32 = arith.constant 3 : i32
    %c8_i32_31 = arith.constant 8 : i32
    %79 = arith.muli %c3_i32, %c8_i32_31 : i32
    %80 = tpu.assume_multiple %79, 8 : i32
    %81 = arith.index_cast %80 : i32 to index
    %c0_32 = arith.constant 0 : index
    %82 = vector.load %arg13[%81, %c0_32] : memref<64x128xf32, #tpu.memory_space<vmem>>, vector<8x128xf32>
    %cst_33 = arith.constant dense<0.000000e+00> : vector<8x128xf32>
    %83 = tpu.matmul %76, %8, %cst_33 {dimension_numbers = #tpu.dot_dimension_numbers<[1], [0], [0], [1], [0, 0, 1, 1], [], []>} : vector<8x128xf32>, vector<128x128xf32>, vector<8x128xf32> -> vector<8x128xf32>
    %84 = arith.addf %83, %11 : vector<8x128xf32>
    %85 = arith.addf %82, %84 : vector<8x128xf32>
    %86 = arith.negf %85 : vector<8x128xf32>
    %87 = math.exp %86 : vector<8x128xf32>
    %cst_34 = arith.constant 1.000000e+00 : f32
    %88 = vector.broadcast %cst_34 : f32 to vector<8x128xf32>
    %89 = arith.addf %88, %87 : vector<8x128xf32>
    %90 = arith.divf %88, %89 : vector<8x128xf32>
    %c64_i32_35 = arith.constant 64 : i32
    %91 = tpu.dynamic_rotate %90 by %c64_i32_35 dim 1 : vector<8x128xf32>, i32 -> vector<8x128xf32>
    %c32_i32_36 = arith.constant 32 : i32
    %92 = tpu.dynamic_rotate %90 by %c32_i32_36 dim 1 : vector<8x128xf32>, i32 -> vector<8x128xf32>
    %93 = arith.mulf %91, %84 : vector<8x128xf32>
    %94 = arith.addf %82, %93 : vector<8x128xf32>
    %95 = math.tanh %94 : vector<8x128xf32>
    %96 = arith.subf %76, %95 : vector<8x128xf32>
    %97 = arith.mulf %92, %96 : vector<8x128xf32>
    %98 = arith.addf %95, %97 : vector<8x128xf32>
    %99 = arith.index_cast %80 : i32 to index
    %c0_37 = arith.constant 0 : index
    %100 = vector.load %arg14[%99, %c0_37] : memref<64x128xf32, #tpu.memory_space<vmem>>, vector<8x128xf32>
    tpu.vector_store %arg14[%99, %c0_37], %98 {strides = array<i32>} : memref<64x128xf32, #tpu.memory_space<vmem>>, vector<8x128xf32>,
    %c4_i32 = arith.constant 4 : i32
    %c8_i32_38 = arith.constant 8 : i32
    %101 = arith.muli %c4_i32, %c8_i32_38 : i32
    %102 = tpu.assume_multiple %101, 8 : i32
    %103 = arith.index_cast %102 : i32 to index
    %c0_39 = arith.constant 0 : index
    %104 = vector.load %arg13[%103, %c0_39] : memref<64x128xf32, #tpu.memory_space<vmem>>, vector<8x128xf32>
    %cst_40 = arith.constant dense<0.000000e+00> : vector<8x128xf32>
    %105 = tpu.matmul %98, %8, %cst_40 {dimension_numbers = #tpu.dot_dimension_numbers<[1], [0], [0], [1], [0, 0, 1, 1], [], []>} : vector<8x128xf32>, vector<128x128xf32>, vector<8x128xf32> -> vector<8x128xf32>
    %106 = arith.addf %105, %11 : vector<8x128xf32>
    %107 = arith.addf %104, %106 : vector<8x128xf32>
    %108 = arith.negf %107 : vector<8x128xf32>
    %109 = math.exp %108 : vector<8x128xf32>
    %cst_41 = arith.constant 1.000000e+00 : f32
    %110 = vector.broadcast %cst_41 : f32 to vector<8x128xf32>
    %111 = arith.addf %110, %109 : vector<8x128xf32>
    %112 = arith.divf %110, %111 : vector<8x128xf32>
    %c64_i32_42 = arith.constant 64 : i32
    %113 = tpu.dynamic_rotate %112 by %c64_i32_42 dim 1 : vector<8x128xf32>, i32 -> vector<8x128xf32>
    %c32_i32_43 = arith.constant 32 : i32
    %114 = tpu.dynamic_rotate %112 by %c32_i32_43 dim 1 : vector<8x128xf32>, i32 -> vector<8x128xf32>
    %115 = arith.mulf %113, %106 : vector<8x128xf32>
    %116 = arith.addf %104, %115 : vector<8x128xf32>
    %117 = math.tanh %116 : vector<8x128xf32>
    %118 = arith.subf %98, %117 : vector<8x128xf32>
    %119 = arith.mulf %114, %118 : vector<8x128xf32>
    %120 = arith.addf %117, %119 : vector<8x128xf32>
    %121 = arith.index_cast %102 : i32 to index
    %c0_44 = arith.constant 0 : index
    %122 = vector.load %arg14[%121, %c0_44] : memref<64x128xf32, #tpu.memory_space<vmem>>, vector<8x128xf32>
    tpu.vector_store %arg14[%121, %c0_44], %120 {strides = array<i32>} : memref<64x128xf32, #tpu.memory_space<vmem>>, vector<8x128xf32>,
    %c5_i32 = arith.constant 5 : i32
    %c8_i32_45 = arith.constant 8 : i32
    %123 = arith.muli %c5_i32, %c8_i32_45 : i32
    %124 = tpu.assume_multiple %123, 8 : i32
    %125 = arith.index_cast %124 : i32 to index
    %c0_46 = arith.constant 0 : index
    %126 = vector.load %arg13[%125, %c0_46] : memref<64x128xf32, #tpu.memory_space<vmem>>, vector<8x128xf32>
    %cst_47 = arith.constant dense<0.000000e+00> : vector<8x128xf32>
    %127 = tpu.matmul %120, %8, %cst_47 {dimension_numbers = #tpu.dot_dimension_numbers<[1], [0], [0], [1], [0, 0, 1, 1], [], []>} : vector<8x128xf32>, vector<128x128xf32>, vector<8x128xf32> -> vector<8x128xf32>
    %128 = arith.addf %127, %11 : vector<8x128xf32>
    %129 = arith.addf %126, %128 : vector<8x128xf32>
    %130 = arith.negf %129 : vector<8x128xf32>
    %131 = math.exp %130 : vector<8x128xf32>
    %cst_48 = arith.constant 1.000000e+00 : f32
    %132 = vector.broadcast %cst_48 : f32 to vector<8x128xf32>
    %133 = arith.addf %132, %131 : vector<8x128xf32>
    %134 = arith.divf %132, %133 : vector<8x128xf32>
    %c64_i32_49 = arith.constant 64 : i32
    %135 = tpu.dynamic_rotate %134 by %c64_i32_49 dim 1 : vector<8x128xf32>, i32 -> vector<8x128xf32>
    %c32_i32_50 = arith.constant 32 : i32
    %136 = tpu.dynamic_rotate %134 by %c32_i32_50 dim 1 : vector<8x128xf32>, i32 -> vector<8x128xf32>
    %137 = arith.mulf %135, %128 : vector<8x128xf32>
    %138 = arith.addf %126, %137 : vector<8x128xf32>
    %139 = math.tanh %138 : vector<8x128xf32>
    %140 = arith.subf %120, %139 : vector<8x128xf32>
    %141 = arith.mulf %136, %140 : vector<8x128xf32>
    %142 = arith.addf %139, %141 : vector<8x128xf32>
    %143 = arith.index_cast %124 : i32 to index
    %c0_51 = arith.constant 0 : index
    %144 = vector.load %arg14[%143, %c0_51] : memref<64x128xf32, #tpu.memory_space<vmem>>, vector<8x128xf32>
    tpu.vector_store %arg14[%143, %c0_51], %142 {strides = array<i32>} : memref<64x128xf32, #tpu.memory_space<vmem>>, vector<8x128xf32>,
    %c6_i32 = arith.constant 6 : i32
    %c8_i32_52 = arith.constant 8 : i32
    %145 = arith.muli %c6_i32, %c8_i32_52 : i32
    %146 = tpu.assume_multiple %145, 8 : i32
    %147 = arith.index_cast %146 : i32 to index
    %c0_53 = arith.constant 0 : index
    %148 = vector.load %arg13[%147, %c0_53] : memref<64x128xf32, #tpu.memory_space<vmem>>, vector<8x128xf32>
    %cst_54 = arith.constant dense<0.000000e+00> : vector<8x128xf32>
    %149 = tpu.matmul %142, %8, %cst_54 {dimension_numbers = #tpu.dot_dimension_numbers<[1], [0], [0], [1], [0, 0, 1, 1], [], []>} : vector<8x128xf32>, vector<128x128xf32>, vector<8x128xf32> -> vector<8x128xf32>
    %150 = arith.addf %149, %11 : vector<8x128xf32>
    %151 = arith.addf %148, %150 : vector<8x128xf32>
    %152 = arith.negf %151 : vector<8x128xf32>
    %153 = math.exp %152 : vector<8x128xf32>
    %cst_55 = arith.constant 1.000000e+00 : f32
    %154 = vector.broadcast %cst_55 : f32 to vector<8x128xf32>
    %155 = arith.addf %154, %153 : vector<8x128xf32>
    %156 = arith.divf %154, %155 : vector<8x128xf32>
    %c64_i32_56 = arith.constant 64 : i32
    %157 = tpu.dynamic_rotate %156 by %c64_i32_56 dim 1 : vector<8x128xf32>, i32 -> vector<8x128xf32>
    %c32_i32_57 = arith.constant 32 : i32
    %158 = tpu.dynamic_rotate %156 by %c32_i32_57 dim 1 : vector<8x128xf32>, i32 -> vector<8x128xf32>
    %159 = arith.mulf %157, %150 : vector<8x128xf32>
    %160 = arith.addf %148, %159 : vector<8x128xf32>
    %161 = math.tanh %160 : vector<8x128xf32>
    %162 = arith.subf %142, %161 : vector<8x128xf32>
    %163 = arith.mulf %158, %162 : vector<8x128xf32>
    %164 = arith.addf %161, %163 : vector<8x128xf32>
    %165 = arith.index_cast %146 : i32 to index
    %c0_58 = arith.constant 0 : index
    %166 = vector.load %arg14[%165, %c0_58] : memref<64x128xf32, #tpu.memory_space<vmem>>, vector<8x128xf32>
    tpu.vector_store %arg14[%165, %c0_58], %164 {strides = array<i32>} : memref<64x128xf32, #tpu.memory_space<vmem>>, vector<8x128xf32>,
    %c7_i32 = arith.constant 7 : i32
    %c8_i32_59 = arith.constant 8 : i32
    %167 = arith.muli %c7_i32, %c8_i32_59 : i32
    %168 = tpu.assume_multiple %167, 8 : i32
    %169 = arith.index_cast %168 : i32 to index
    %c0_60 = arith.constant 0 : index
    %170 = vector.load %arg13[%169, %c0_60] : memref<64x128xf32, #tpu.memory_space<vmem>>, vector<8x128xf32>
    %cst_61 = arith.constant dense<0.000000e+00> : vector<8x128xf32>
    %171 = tpu.matmul %164, %8, %cst_61 {dimension_numbers = #tpu.dot_dimension_numbers<[1], [0], [0], [1], [0, 0, 1, 1], [], []>} : vector<8x128xf32>, vector<128x128xf32>, vector<8x128xf32> -> vector<8x128xf32>
    %172 = arith.addf %171, %11 : vector<8x128xf32>
    %173 = arith.addf %170, %172 : vector<8x128xf32>
    %174 = arith.negf %173 : vector<8x128xf32>
    %175 = math.exp %174 : vector<8x128xf32>
    %cst_62 = arith.constant 1.000000e+00 : f32
    %176 = vector.broadcast %cst_62 : f32 to vector<8x128xf32>
    %177 = arith.addf %176, %175 : vector<8x128xf32>
    %178 = arith.divf %176, %177 : vector<8x128xf32>
    %c64_i32_63 = arith.constant 64 : i32
    %179 = tpu.dynamic_rotate %178 by %c64_i32_63 dim 1 : vector<8x128xf32>, i32 -> vector<8x128xf32>
    %c32_i32_64 = arith.constant 32 : i32
    %180 = tpu.dynamic_rotate %178 by %c32_i32_64 dim 1 : vector<8x128xf32>, i32 -> vector<8x128xf32>
    %181 = arith.mulf %179, %172 : vector<8x128xf32>
    %182 = arith.addf %170, %181 : vector<8x128xf32>
    %183 = math.tanh %182 : vector<8x128xf32>
    %184 = arith.subf %164, %183 : vector<8x128xf32>
    %185 = arith.mulf %180, %184 : vector<8x128xf32>
    %186 = arith.addf %183, %185 : vector<8x128xf32>
    %187 = arith.index_cast %168 : i32 to index
    %c0_65 = arith.constant 0 : index
    %188 = vector.load %arg14[%187, %c0_65] : memref<64x128xf32, #tpu.memory_space<vmem>>, vector<8x128xf32>
    tpu.vector_store %arg14[%187, %c0_65], %186 {strides = array<i32>} : memref<64x128xf32, #tpu.memory_space<vmem>>, vector<8x128xf32>,
    %c8_i32_66 = arith.constant 8 : i32
    %c0_67 = arith.constant 0 : index
    %c0_68 = arith.constant 0 : index
    %189 = vector.load %arg14[%c0_67, %c0_68] : memref<64x128xf32, #tpu.memory_space<vmem>>, vector<64x128xf32>
    %c0_69 = arith.constant 0 : index
    %c0_70 = arith.constant 0 : index
    %190 = vector.load %arg6[%c0_69, %c0_70] : memref<128x128xf32, #tpu.memory_space<vmem>>, vector<128x128xf32>
    %cst_71 = arith.constant dense<0.000000e+00> : vector<64x128xf32>
    %191 = tpu.matmul %189, %190, %cst_71 {dimension_numbers = #tpu.dot_dimension_numbers<[1], [0], [0], [1], [0, 0, 1, 1], [], []>} : vector<64x128xf32>, vector<128x128xf32>, vector<64x128xf32> -> vector<64x128xf32>
    %c0_72 = arith.constant 0 : index
    %c0_73 = arith.constant 0 : index
    %192 = vector.load %arg8[%c0_72, %c0_73] : memref<1x128xf32, #tpu.memory_space<vmem>>, vector<1x128xf32>
    %193 = vector.broadcast %192 : vector<1x128xf32> to vector<64x128xf32>
    %194 = arith.addf %191, %193 : vector<64x128xf32>
    %c0_74 = arith.constant 0 : index
    %c0_75 = arith.constant 0 : index
    %195 = vector.load %arg13[%c0_74, %c0_75] : memref<64x128xf32, #tpu.memory_space<vmem>>, vector<64x128xf32>
    tpu.vector_store %arg13[%c0_74, %c0_75], %194 {strides = array<i32>} : memref<64x128xf32, #tpu.memory_space<vmem>>, vector<64x128xf32>,
    %c0_76 = arith.constant 0 : index
    %c0_77 = arith.constant 0 : index
    %196 = vector.load %arg7[%c0_76, %c0_77] : memref<128x128xf32, #tpu.memory_space<vmem>>, vector<128x128xf32>
    %c0_78 = arith.constant 0 : index
    %c0_79 = arith.constant 0 : index
    %197 = vector.load %arg9[%c0_78, %c0_79] : memref<1x128xf32, #tpu.memory_space<vmem>>, vector<1x128xf32>
    %198 = vector.shape_cast %197 : vector<1x128xf32> to vector<1x128xf32>
    %199 = vector.broadcast %198 : vector<1x128xf32> to vector<8x128xf32>
    %cst_80 = arith.constant 0.000000e+00 : f32
    %200 = vector.broadcast %cst_80 : f32 to vector<8x128xf32>
    %c0_i32_81 = arith.constant 0 : i32
    %c8_i32_82 = arith.constant 8 : i32
    %201 = arith.muli %c0_i32_81, %c8_i32_82 : i32
    %202 = tpu.assume_multiple %201, 8 : i32
    %203 = arith.index_cast %202 : i32 to index
    %c0_83 = arith.constant 0 : index
    %204 = vector.load %arg13[%203, %c0_83] : memref<64x128xf32, #tpu.memory_space<vmem>>, vector<8x128xf32>
    %cst_84 = arith.constant dense<0.000000e+00> : vector<8x128xf32>
    %205 = tpu.matmul %200, %196, %cst_84 {dimension_numbers = #tpu.dot_dimension_numbers<[1], [0], [0], [1], [0, 0, 1, 1], [], []>} : vector<8x128xf32>, vector<128x128xf32>, vector<8x128xf32> -> vector<8x128xf32>
    %206 = arith.addf %205, %199 : vector<8x128xf32>
    %207 = arith.addf %204, %206 : vector<8x128xf32>
    %208 = arith.negf %207 : vector<8x128xf32>
    %209 = math.exp %208 : vector<8x128xf32>
    %cst_85 = arith.constant 1.000000e+00 : f32
    %210 = vector.broadcast %cst_85 : f32 to vector<8x128xf32>
    %211 = arith.addf %210, %209 : vector<8x128xf32>
    %212 = arith.divf %210, %211 : vector<8x128xf32>
    %c64_i32_86 = arith.constant 64 : i32
    %213 = tpu.dynamic_rotate %212 by %c64_i32_86 dim 1 : vector<8x128xf32>, i32 -> vector<8x128xf32>
    %c32_i32_87 = arith.constant 32 : i32
    %214 = tpu.dynamic_rotate %212 by %c32_i32_87 dim 1 : vector<8x128xf32>, i32 -> vector<8x128xf32>
    %215 = arith.mulf %213, %206 : vector<8x128xf32>
    %216 = arith.addf %204, %215 : vector<8x128xf32>
    %217 = math.tanh %216 : vector<8x128xf32>
    %218 = arith.subf %200, %217 : vector<8x128xf32>
    %219 = arith.mulf %214, %218 : vector<8x128xf32>
    %220 = arith.addf %217, %219 : vector<8x128xf32>
    %c1_i32_88 = arith.constant 1 : i32
    %c8_i32_89 = arith.constant 8 : i32
    %221 = arith.muli %c1_i32_88, %c8_i32_89 : i32
    %222 = tpu.assume_multiple %221, 8 : i32
    %223 = arith.index_cast %222 : i32 to index
    %c0_90 = arith.constant 0 : index
    %224 = vector.load %arg13[%223, %c0_90] : memref<64x128xf32, #tpu.memory_space<vmem>>, vector<8x128xf32>
    %cst_91 = arith.constant dense<0.000000e+00> : vector<8x128xf32>
    %225 = tpu.matmul %220, %196, %cst_91 {dimension_numbers = #tpu.dot_dimension_numbers<[1], [0], [0], [1], [0, 0, 1, 1], [], []>} : vector<8x128xf32>, vector<128x128xf32>, vector<8x128xf32> -> vector<8x128xf32>
    %226 = arith.addf %225, %199 : vector<8x128xf32>
    %227 = arith.addf %224, %226 : vector<8x128xf32>
    %228 = arith.negf %227 : vector<8x128xf32>
    %229 = math.exp %228 : vector<8x128xf32>
    %cst_92 = arith.constant 1.000000e+00 : f32
    %230 = vector.broadcast %cst_92 : f32 to vector<8x128xf32>
    %231 = arith.addf %230, %229 : vector<8x128xf32>
    %232 = arith.divf %230, %231 : vector<8x128xf32>
    %c64_i32_93 = arith.constant 64 : i32
    %233 = tpu.dynamic_rotate %232 by %c64_i32_93 dim 1 : vector<8x128xf32>, i32 -> vector<8x128xf32>
    %c32_i32_94 = arith.constant 32 : i32
    %234 = tpu.dynamic_rotate %232 by %c32_i32_94 dim 1 : vector<8x128xf32>, i32 -> vector<8x128xf32>
    %235 = arith.mulf %233, %226 : vector<8x128xf32>
    %236 = arith.addf %224, %235 : vector<8x128xf32>
    %237 = math.tanh %236 : vector<8x128xf32>
    %238 = arith.subf %220, %237 : vector<8x128xf32>
    %239 = arith.mulf %234, %238 : vector<8x128xf32>
    %240 = arith.addf %237, %239 : vector<8x128xf32>
    %c2_i32_95 = arith.constant 2 : i32
    %c8_i32_96 = arith.constant 8 : i32
    %241 = arith.muli %c2_i32_95, %c8_i32_96 : i32
    %242 = tpu.assume_multiple %241, 8 : i32
    %243 = arith.index_cast %242 : i32 to index
    %c0_97 = arith.constant 0 : index
    %244 = vector.load %arg13[%243, %c0_97] : memref<64x128xf32, #tpu.memory_space<vmem>>, vector<8x128xf32>
    %cst_98 = arith.constant dense<0.000000e+00> : vector<8x128xf32>
    %245 = tpu.matmul %240, %196, %cst_98 {dimension_numbers = #tpu.dot_dimension_numbers<[1], [0], [0], [1], [0, 0, 1, 1], [], []>} : vector<8x128xf32>, vector<128x128xf32>, vector<8x128xf32> -> vector<8x128xf32>
    %246 = arith.addf %245, %199 : vector<8x128xf32>
    %247 = arith.addf %244, %246 : vector<8x128xf32>
    %248 = arith.negf %247 : vector<8x128xf32>
    %249 = math.exp %248 : vector<8x128xf32>
    %cst_99 = arith.constant 1.000000e+00 : f32
    %250 = vector.broadcast %cst_99 : f32 to vector<8x128xf32>
    %251 = arith.addf %250, %249 : vector<8x128xf32>
    %252 = arith.divf %250, %251 : vector<8x128xf32>
    %c64_i32_100 = arith.constant 64 : i32
    %253 = tpu.dynamic_rotate %252 by %c64_i32_100 dim 1 : vector<8x128xf32>, i32 -> vector<8x128xf32>
    %c32_i32_101 = arith.constant 32 : i32
    %254 = tpu.dynamic_rotate %252 by %c32_i32_101 dim 1 : vector<8x128xf32>, i32 -> vector<8x128xf32>
    %255 = arith.mulf %253, %246 : vector<8x128xf32>
    %256 = arith.addf %244, %255 : vector<8x128xf32>
    %257 = math.tanh %256 : vector<8x128xf32>
    %258 = arith.subf %240, %257 : vector<8x128xf32>
    %259 = arith.mulf %254, %258 : vector<8x128xf32>
    %260 = arith.addf %257, %259 : vector<8x128xf32>
    %c3_i32_102 = arith.constant 3 : i32
    %c8_i32_103 = arith.constant 8 : i32
    %261 = arith.muli %c3_i32_102, %c8_i32_103 : i32
    %262 = tpu.assume_multiple %261, 8 : i32
    %263 = arith.index_cast %262 : i32 to index
    %c0_104 = arith.constant 0 : index
    %264 = vector.load %arg13[%263, %c0_104] : memref<64x128xf32, #tpu.memory_space<vmem>>, vector<8x128xf32>
    %cst_105 = arith.constant dense<0.000000e+00> : vector<8x128xf32>
    %265 = tpu.matmul %260, %196, %cst_105 {dimension_numbers = #tpu.dot_dimension_numbers<[1], [0], [0], [1], [0, 0, 1, 1], [], []>} : vector<8x128xf32>, vector<128x128xf32>, vector<8x128xf32> -> vector<8x128xf32>
    %266 = arith.addf %265, %199 : vector<8x128xf32>
    %267 = arith.addf %264, %266 : vector<8x128xf32>
    %268 = arith.negf %267 : vector<8x128xf32>
    %269 = math.exp %268 : vector<8x128xf32>
    %cst_106 = arith.constant 1.000000e+00 : f32
    %270 = vector.broadcast %cst_106 : f32 to vector<8x128xf32>
    %271 = arith.addf %270, %269 : vector<8x128xf32>
    %272 = arith.divf %270, %271 : vector<8x128xf32>
    %c64_i32_107 = arith.constant 64 : i32
    %273 = tpu.dynamic_rotate %272 by %c64_i32_107 dim 1 : vector<8x128xf32>, i32 -> vector<8x128xf32>
    %c32_i32_108 = arith.constant 32 : i32
    %274 = tpu.dynamic_rotate %272 by %c32_i32_108 dim 1 : vector<8x128xf32>, i32 -> vector<8x128xf32>
    %275 = arith.mulf %273, %266 : vector<8x128xf32>
    %276 = arith.addf %264, %275 : vector<8x128xf32>
    %277 = math.tanh %276 : vector<8x128xf32>
    %278 = arith.subf %260, %277 : vector<8x128xf32>
    %279 = arith.mulf %274, %278 : vector<8x128xf32>
    %280 = arith.addf %277, %279 : vector<8x128xf32>
    %c4_i32_109 = arith.constant 4 : i32
    %c8_i32_110 = arith.constant 8 : i32
    %281 = arith.muli %c4_i32_109, %c8_i32_110 : i32
    %282 = tpu.assume_multiple %281, 8 : i32
    %283 = arith.index_cast %282 : i32 to index
    %c0_111 = arith.constant 0 : index
    %284 = vector.load %arg13[%283, %c0_111] : memref<64x128xf32, #tpu.memory_space<vmem>>, vector<8x128xf32>
    %cst_112 = arith.constant dense<0.000000e+00> : vector<8x128xf32>
    %285 = tpu.matmul %280, %196, %cst_112 {dimension_numbers = #tpu.dot_dimension_numbers<[1], [0], [0], [1], [0, 0, 1, 1], [], []>} : vector<8x128xf32>, vector<128x128xf32>, vector<8x128xf32> -> vector<8x128xf32>
    %286 = arith.addf %285, %199 : vector<8x128xf32>
    %287 = arith.addf %284, %286 : vector<8x128xf32>
    %288 = arith.negf %287 : vector<8x128xf32>
    %289 = math.exp %288 : vector<8x128xf32>
    %cst_113 = arith.constant 1.000000e+00 : f32
    %290 = vector.broadcast %cst_113 : f32 to vector<8x128xf32>
    %291 = arith.addf %290, %289 : vector<8x128xf32>
    %292 = arith.divf %290, %291 : vector<8x128xf32>
    %c64_i32_114 = arith.constant 64 : i32
    %293 = tpu.dynamic_rotate %292 by %c64_i32_114 dim 1 : vector<8x128xf32>, i32 -> vector<8x128xf32>
    %c32_i32_115 = arith.constant 32 : i32
    %294 = tpu.dynamic_rotate %292 by %c32_i32_115 dim 1 : vector<8x128xf32>, i32 -> vector<8x128xf32>
    %295 = arith.mulf %293, %286 : vector<8x128xf32>
    %296 = arith.addf %284, %295 : vector<8x128xf32>
    %297 = math.tanh %296 : vector<8x128xf32>
    %298 = arith.subf %280, %297 : vector<8x128xf32>
    %299 = arith.mulf %294, %298 : vector<8x128xf32>
    %300 = arith.addf %297, %299 : vector<8x128xf32>
    %c5_i32_116 = arith.constant 5 : i32
    %c8_i32_117 = arith.constant 8 : i32
    %301 = arith.muli %c5_i32_116, %c8_i32_117 : i32
    %302 = tpu.assume_multiple %301, 8 : i32
    %303 = arith.index_cast %302 : i32 to index
    %c0_118 = arith.constant 0 : index
    %304 = vector.load %arg13[%303, %c0_118] : memref<64x128xf32, #tpu.memory_space<vmem>>, vector<8x128xf32>
    %cst_119 = arith.constant dense<0.000000e+00> : vector<8x128xf32>
    %305 = tpu.matmul %300, %196, %cst_119 {dimension_numbers = #tpu.dot_dimension_numbers<[1], [0], [0], [1], [0, 0, 1, 1], [], []>} : vector<8x128xf32>, vector<128x128xf32>, vector<8x128xf32> -> vector<8x128xf32>
    %306 = arith.addf %305, %199 : vector<8x128xf32>
    %307 = arith.addf %304, %306 : vector<8x128xf32>
    %308 = arith.negf %307 : vector<8x128xf32>
    %309 = math.exp %308 : vector<8x128xf32>
    %cst_120 = arith.constant 1.000000e+00 : f32
    %310 = vector.broadcast %cst_120 : f32 to vector<8x128xf32>
    %311 = arith.addf %310, %309 : vector<8x128xf32>
    %312 = arith.divf %310, %311 : vector<8x128xf32>
    %c64_i32_121 = arith.constant 64 : i32
    %313 = tpu.dynamic_rotate %312 by %c64_i32_121 dim 1 : vector<8x128xf32>, i32 -> vector<8x128xf32>
    %c32_i32_122 = arith.constant 32 : i32
    %314 = tpu.dynamic_rotate %312 by %c32_i32_122 dim 1 : vector<8x128xf32>, i32 -> vector<8x128xf32>
    %315 = arith.mulf %313, %306 : vector<8x128xf32>
    %316 = arith.addf %304, %315 : vector<8x128xf32>
    %317 = math.tanh %316 : vector<8x128xf32>
    %318 = arith.subf %300, %317 : vector<8x128xf32>
    %319 = arith.mulf %314, %318 : vector<8x128xf32>
    %320 = arith.addf %317, %319 : vector<8x128xf32>
    %c6_i32_123 = arith.constant 6 : i32
    %c8_i32_124 = arith.constant 8 : i32
    %321 = arith.muli %c6_i32_123, %c8_i32_124 : i32
    %322 = tpu.assume_multiple %321, 8 : i32
    %323 = arith.index_cast %322 : i32 to index
    %c0_125 = arith.constant 0 : index
    %324 = vector.load %arg13[%323, %c0_125] : memref<64x128xf32, #tpu.memory_space<vmem>>, vector<8x128xf32>
    %cst_126 = arith.constant dense<0.000000e+00> : vector<8x128xf32>
    %325 = tpu.matmul %320, %196, %cst_126 {dimension_numbers = #tpu.dot_dimension_numbers<[1], [0], [0], [1], [0, 0, 1, 1], [], []>} : vector<8x128xf32>, vector<128x128xf32>, vector<8x128xf32> -> vector<8x128xf32>
    %326 = arith.addf %325, %199 : vector<8x128xf32>
    %327 = arith.addf %324, %326 : vector<8x128xf32>
    %328 = arith.negf %327 : vector<8x128xf32>
    %329 = math.exp %328 : vector<8x128xf32>
    %cst_127 = arith.constant 1.000000e+00 : f32
    %330 = vector.broadcast %cst_127 : f32 to vector<8x128xf32>
    %331 = arith.addf %330, %329 : vector<8x128xf32>
    %332 = arith.divf %330, %331 : vector<8x128xf32>
    %c64_i32_128 = arith.constant 64 : i32
    %333 = tpu.dynamic_rotate %332 by %c64_i32_128 dim 1 : vector<8x128xf32>, i32 -> vector<8x128xf32>
    %c32_i32_129 = arith.constant 32 : i32
    %334 = tpu.dynamic_rotate %332 by %c32_i32_129 dim 1 : vector<8x128xf32>, i32 -> vector<8x128xf32>
    %335 = arith.mulf %333, %326 : vector<8x128xf32>
    %336 = arith.addf %324, %335 : vector<8x128xf32>
    %337 = math.tanh %336 : vector<8x128xf32>
    %338 = arith.subf %320, %337 : vector<8x128xf32>
    %339 = arith.mulf %334, %338 : vector<8x128xf32>
    %340 = arith.addf %337, %339 : vector<8x128xf32>
    %c7_i32_130 = arith.constant 7 : i32
    %c8_i32_131 = arith.constant 8 : i32
    %341 = arith.muli %c7_i32_130, %c8_i32_131 : i32
    %342 = tpu.assume_multiple %341, 8 : i32
    %343 = arith.index_cast %342 : i32 to index
    %c0_132 = arith.constant 0 : index
    %344 = vector.load %arg13[%343, %c0_132] : memref<64x128xf32, #tpu.memory_space<vmem>>, vector<8x128xf32>
    %cst_133 = arith.constant dense<0.000000e+00> : vector<8x128xf32>
    %345 = tpu.matmul %340, %196, %cst_133 {dimension_numbers = #tpu.dot_dimension_numbers<[1], [0], [0], [1], [0, 0, 1, 1], [], []>} : vector<8x128xf32>, vector<128x128xf32>, vector<8x128xf32> -> vector<8x128xf32>
    %346 = arith.addf %345, %199 : vector<8x128xf32>
    %347 = arith.addf %344, %346 : vector<8x128xf32>
    %348 = arith.negf %347 : vector<8x128xf32>
    %349 = math.exp %348 : vector<8x128xf32>
    %cst_134 = arith.constant 1.000000e+00 : f32
    %350 = vector.broadcast %cst_134 : f32 to vector<8x128xf32>
    %351 = arith.addf %350, %349 : vector<8x128xf32>
    %352 = arith.divf %350, %351 : vector<8x128xf32>
    %c64_i32_135 = arith.constant 64 : i32
    %353 = tpu.dynamic_rotate %352 by %c64_i32_135 dim 1 : vector<8x128xf32>, i32 -> vector<8x128xf32>
    %c32_i32_136 = arith.constant 32 : i32
    %354 = tpu.dynamic_rotate %352 by %c32_i32_136 dim 1 : vector<8x128xf32>, i32 -> vector<8x128xf32>
    %355 = arith.mulf %353, %346 : vector<8x128xf32>
    %356 = arith.addf %344, %355 : vector<8x128xf32>
    %357 = math.tanh %356 : vector<8x128xf32>
    %358 = arith.subf %340, %357 : vector<8x128xf32>
    %359 = arith.mulf %354, %358 : vector<8x128xf32>
    %360 = arith.addf %357, %359 : vector<8x128xf32>
    %c8_i32_137 = arith.constant 8 : i32
    %c0_138 = arith.constant 0 : index
    %c0_139 = arith.constant 0 : index
    %361 = vector.load %arg10[%c0_138, %c0_139] : memref<128x1xf32, #tpu.memory_space<vmem>>, vector<128x1xf32>
    %cst_140 = arith.constant dense<0.000000e+00> : vector<8x1xf32>
    %362 = tpu.matmul %360, %361, %cst_140 {dimension_numbers = #tpu.dot_dimension_numbers<[1], [0], [0], [1], [0, 0, 1, 1], [], []>} : vector<8x128xf32>, vector<128x1xf32>, vector<8x1xf32> -> vector<8x1xf32>
    %c0_141 = arith.constant 0 : index
    %c0_142 = arith.constant 0 : index
    %363 = vector.load %arg11[%c0_141, %c0_142] : memref<1x1xf32, #tpu.memory_space<vmem>>, vector<1x1xf32>
    %364 = vector.broadcast %363 : vector<1x1xf32> to vector<8x1xf32>
    %365 = arith.addf %362, %364 : vector<8x1xf32>
    %c0_143 = arith.constant 0 : index
    %c0_144 = arith.constant 0 : index
    %c0_145 = arith.constant 0 : index
    %366 = vector.load %arg12[%c0_143, %c0_144, %c0_145] : memref<1x8x1xf32, #tpu.memory_space<vmem>>, vector<1x8x1xf32>
    %367 = vector.shape_cast %366 : vector<1x8x1xf32> to vector<8x1xf32>
    %368 = vector.shape_cast %365 : vector<8x1xf32> to vector<1x8x1xf32>
    tpu.vector_store %arg12[%c0_143, %c0_144, %c0_145], %368 {strides = array<i32>} : memref<1x8x1xf32, #tpu.memory_space<vmem>>, vector<1x8x1xf32>,
    return
  }
  func.func @transform_0(%arg0: i32) -> (i32, i32, i32) {
    %c0_i32 = arith.constant 0 : i32
    %c0_i32_0 = arith.constant 0 : i32
    %c0_i32_1 = arith.constant 0 : i32
    return %arg0, %c0_i32, %c0_i32_0 : i32, i32, i32
  }
  func.func @transform_1(%arg0: i32) -> (i32, i32) {
    %c0_i32 = arith.constant 0 : i32
    %c0_i32_0 = arith.constant 0 : i32
    %c0_i32_1 = arith.constant 0 : i32
    return %c0_i32, %c0_i32_0 : i32, i32
  }
  func.func @transform_2(%arg0: i32) -> (i32, i32) {
    %c0_i32 = arith.constant 0 : i32
    %c0_i32_0 = arith.constant 0 : i32
    %c0_i32_1 = arith.constant 0 : i32
    return %c0_i32, %c0_i32_0 : i32, i32
  }
  func.func @transform_3(%arg0: i32) -> (i32, i32) {
    %c0_i32 = arith.constant 0 : i32
    %c0_i32_0 = arith.constant 0 : i32
    %c0_i32_1 = arith.constant 0 : i32
    return %c0_i32, %c0_i32_0 : i32, i32
  }
  func.func @transform_4(%arg0: i32) -> (i32, i32) {
    %c0_i32 = arith.constant 0 : i32
    %c0_i32_0 = arith.constant 0 : i32
    %c0_i32_1 = arith.constant 0 : i32
    return %c0_i32, %c0_i32_0 : i32, i32
  }
  func.func @transform_5(%arg0: i32) -> (i32, i32) {
    %c0_i32 = arith.constant 0 : i32
    %c0_i32_0 = arith.constant 0 : i32
    %c0_i32_1 = arith.constant 0 : i32
    return %c0_i32, %c0_i32_0 : i32, i32
  }
  func.func @transform_6(%arg0: i32) -> (i32, i32) {
    %c0_i32 = arith.constant 0 : i32
    %c0_i32_0 = arith.constant 0 : i32
    %c0_i32_1 = arith.constant 0 : i32
    return %c0_i32, %c0_i32_0 : i32, i32
  }
  func.func @transform_7(%arg0: i32) -> (i32, i32) {
    %c0_i32 = arith.constant 0 : i32
    %c0_i32_0 = arith.constant 0 : i32
    %c0_i32_1 = arith.constant 0 : i32
    return %c0_i32, %c0_i32_0 : i32, i32
  }
  func.func @transform_8(%arg0: i32) -> (i32, i32) {
    %c0_i32 = arith.constant 0 : i32
    %c0_i32_0 = arith.constant 0 : i32
    %c0_i32_1 = arith.constant 0 : i32
    return %c0_i32, %c0_i32_0 : i32, i32
  }
  func.func @transform_9(%arg0: i32) -> (i32, i32) {
    %c0_i32 = arith.constant 0 : i32
    %c0_i32_0 = arith.constant 0 : i32
    %c0_i32_1 = arith.constant 0 : i32
    return %c0_i32, %c0_i32_0 : i32, i32
  }
  func.func @transform_10(%arg0: i32) -> (i32, i32) {
    %c0_i32 = arith.constant 0 : i32
    %c0_i32_0 = arith.constant 0 : i32
    %c0_i32_1 = arith.constant 0 : i32
    return %c0_i32, %c0_i32_0 : i32, i32
  }
  func.func @transform_11(%arg0: i32) -> (i32, i32, i32) {
    %c0_i32 = arith.constant 0 : i32
    %c0_i32_0 = arith.constant 0 : i32
    %c0_i32_1 = arith.constant 0 : i32
    return %arg0, %c0_i32, %c0_i32_0 : i32, i32, i32
  }
}

</mosaic_0001>

<bundles_post_ra>
// kernel: fwd.1
= control target key start
LH: loop header
LB: loop body
LE: loop exit
PB: predicated region body
PF: predicated region fallthrough
CT: control target
= control target key end

     0   :  { %s4100_s0 = inlined_call_operand.vmem [shape: f32[1,64,4], index: 0, kind: input, shape index: {}]   ;;  %s4101_s1 = inlined_call_operand.vmem [shape: f32[4,128], index: 1, kind: input, shape index: {}]   ;;  %s4102_s2 = inlined_call_operand.hbm [shape: f32[128,128], index: 2, kind: input, shape index: {}]   ;;  %s4103_s3 = inlined_call_operand.vmem [shape: f32[1,128], index: 3, kind: input, shape index: {}]   ;;  %s4104_s4 = inlined_call_operand.vmem [shape: f32[1,128], index: 4, kind: input, shape index: {}]   ;;  %s4105_s5 = inlined_call_operand.hbm [shape: f32[128,128], index: 5, kind: input, shape index: {}]   ;;  %s4106_s6 = inlined_call_operand.hbm [shape: f32[128,128], index: 6, kind: input, shape index: {}]   ;;  %s4107_s7 = inlined_call_operand.vmem [shape: f32[1,128], index: 7, kind: input, shape index: {}]   ;;  %s4108_s8 = inlined_call_operand.vmem [shape: f32[1,128], index: 8, kind: input, shape index: {}]   ;;  %s4109_s9 = inlined_call_operand.hbm [shape: f32[128,1], index: 9, kind: input, shape index: {}]   ;;  %s4110_s10 = inlined_call_operand.<no memory space> [shape: f32[1,1], index: 10, kind: input, shape index: {}]   ;;  %s4111_s11 = inlined_call_operand.vmem [shape: f32[1,8,1], index: 11, kind: output, shape index: {}]  }
   0x1   :  { %v16_v0 = vstv %s4110_s10 }
   0x2   :  { %17 = vst [vmem:[#allocation4] sm:$0x1] %v16_v0 }
   0x3   :  { %18 = vsyncpa [#allocation6], 0 }
   0x4   :  { %19 = vsyncpa [#allocation8], 0 }
   0x5   :  { %20 = vsyncpa [#allocation11], 0  ;;  %s3174_s19 = smov [#allocation7]   ;;  %s3175_s21 = smov [#allocation5]  }
   0x6   :  { %s46_s20 = sshll.u32 %s3174_s19, 4  ;;  %s30_s22 = sshll.u32 %s3175_s21, 4  ;;  %s47_s20 = int_to_ptr.vmem [resolvable:$true] %s46_s20  ;;  %s31_s22 = int_to_ptr.vmem [resolvable:$true] %s30_s22 }
   0x7   :  { %s3096_s23 = scalar_lea.vmem %s47_s20, 2048  ;;  %p3101_p1 = scmp.lt.s32.totalorder %s47_s20, %s47_s20 }
   0x8   :  { %p3097_p0 = scmp.ne.s32.totalorder %s47_s20, %s3096_s23  ;;  %p3102_p2 = scmp.lt.s32.totalorder %s3096_s23, %s3096_s23 }
   0xa   :  { %p3103_p3 = por %p3102_p2, %p3101_p1 }
   0xc   :  { %p3104_p4 = pnand %p3103_p3, %p3097_p0 }
   0xe   :  { %3107 = shalt.err (!%p3104_p4)
}
   0xf   :  { %s3176_s24 = smov 128   ;;  %s3177_s25 = smov 8  }
  0x10   :  { %52 = dma.hbm_to_vmem [thread:$0]  %s4105_s5, 2048, %s47_s20, [#allocation8], %s3176_s24, %s3176_s24, %s3177_s25  }
  0x11   :  { %s3116_s27 = scalar_lea.vmem %s31_s22, 2048  ;;  %p3121_p6 = scmp.lt.s32.totalorder %s31_s22, %s31_s22 }
  0x12   :  { %p3117_p5 = scmp.ne.s32.totalorder %s31_s22, %s3116_s27  ;;  %p3122_p7 = scmp.lt.s32.totalorder %s3116_s27, %s3116_s27 }
  0x14   :  { %p3123_p8 = por %p3122_p7, %p3121_p6 }
  0x16   :  { %p3124_p9 = pnand %p3123_p8, %p3117_p5 }
  0x18   :  { %3127 = shalt.err (!%p3124_p9)
}
  0x19   :  { %36 = dma.hbm_to_vmem [thread:$0]  %s4102_s2, 2048, %s31_s22, [#allocation6], %s3176_s24, %s3176_s24, %s3177_s25  }
  0x1a   :  { %s3178_s30 = smov [#allocation9]   ;;  %s3179_s13 = smov [#allocation10]  }
  0x1b   :  { %s58_s12 = sshll.u32 %s3178_s30, 4  ;;  %s74_s14 = sshll.u32 %s3179_s13, 4  ;;  %s59_s12 = int_to_ptr.vmem [resolvable:$true] %s58_s12  ;;  %s75_s14 = int_to_ptr.vmem [resolvable:$true] %s74_s14 }
  0x1c   :  { %s3136_s5 = scalar_lea.vmem %s59_s12, 2048  ;;  %p3141_p11 = scmp.lt.s32.totalorder %s59_s12, %s59_s12 }
  0x1d   :  { %p3137_p10 = scmp.ne.s32.totalorder %s59_s12, %s3136_s5  ;;  %p3142_p12 = scmp.lt.s32.totalorder %s3136_s5, %s3136_s5 }
  0x1f   :  { %p3143_p13 = por %p3142_p12, %p3141_p11 }
  0x21   :  { %p3144_p0 = pnand %p3143_p13, %p3137_p10 }
  0x23   :  { %3147 = shalt.err (!%p3144_p0)
}
  0x24   :  { %64 = dma.hbm_to_vmem [thread:$0]  %s4106_s6, 2048, %s59_s12, [#allocation8], %s3176_s24, %s3176_s24, %s3177_s25  }
  0x25   :  { %s3156_s2 = scalar_lea.vmem %s75_s14, 2048  ;;  %p3161_p2 = scmp.lt.s32.totalorder %s75_s14, %s75_s14 }
  0x26   :  { %p3157_p1 = scmp.ne.s32.totalorder %s75_s14, %s3156_s2  ;;  %p3162_p3 = scmp.lt.s32.totalorder %s3156_s2, %s3156_s2 }
  0x28   :  { %p3163_p4 = por %p3162_p3, %p3161_p2 }
  0x2a   :  { %p3164_p5 = pnand %p3163_p4, %p3157_p1 }
  0x2c   :  { %3167 = shalt.err (!%p3164_p5)
}
  0x2d   :  { %80 = dma.hbm_to_vmem [thread:$0]  %s4109_s9, 2048, %s75_s14, [#allocation11], %s3176_s24, %s3176_s24, %s3177_s25  }
  0x2e   :  { %3168 = dma.done.wait [#allocation6], 2048  }
  0x2f   :  { %3169 = vsyncadd [#allocation6], 4294965248 }
  0x30   :  { %3170 = dma.done.wait [#allocation8], 4096  }
  0x31   :  { %3171 = vsyncadd [#allocation8], 4294963200 }
  0x32   :  { %3172 = dma.done.wait [#allocation11], 2048  }
  0x33   :  { %3173 = vsyncadd [#allocation11], 4294965248  ;;  %v3180_v1 = vmov 0.0   ;;  %vm3181_vm0 = vmmov 0   ;;  %v3274_v2 = vld [vmem:[#allocation5 + $0x78] sm:$0xff]  ;;  %v3276_v3 = vld [vmem:[#allocation5 + $0x70] sm:$0xff] }
  0x34   :  { %2341 = vmatprep.subr.mxu1 %v3180_v1  ;;  %2373 = vmatprep.mubr.msk.f32.mxu1 %vm3181_vm0, %v3180_v1  ;;  %v3280_v4 = vld [vmem:[#allocation5 + $0x68] sm:$0xff]  ;;  %vm136_vm1 = vcmask 1043456   ;;  %v3284_v5 = vld [vmem:[#allocation5 + $0x60] sm:$0xff]  ;;  %vm111_vm2 = vcmask 31744   ;;  %v3297_v9 = vld [vmem:[#allocation5 + $0x58] sm:$0xff]  ;;  %s3182_s12 = smov 64  }
  0x35   :  { %2342 = vmatpush3.msra.mxu1 %v3274_v2  ;;  %v103_v6 = vld [vmem:[%s4101_s1] sm:$0xf]  ;;  %v96_v8 = vld [vmem:[%s4100_s0 + $0x8] sm:$0xff]  ;;  %v3302_v10 = vld [vmem:[#allocation5 + $0x50] sm:$0xff]  ;;  %s3183_s16 = smov 32   ;;  %vm1966_vm3 = vcmask 7168  }
  0x36   :  { %2343 = vmatprep.subr.mxu1 %v3180_v1  ;;  %v95_v7 = vld [vmem:[%s4100_s0] sm:$0xff]  ;;  %2327 = vmatprep.subr.msk.mxu0 %vm136_vm1, %v103_v6  ;;  %v3308_v11 = vld [vmem:[#allocation5 + $0x48] sm:$0xff]  ;;  %v3326_v14 = vld [vmem:[#allocation5 + $0x30] sm:$0xff] }
  0x37   :  { %2344 = vmatpush3.msra.mxu1 %v3276_v3  ;;  %2328 = vmatpush3.msk.msra.mxu0 %vm136_vm1, %v103_v6  ;;  %v3314_v12 = vld [vmem:[#allocation5 + $0x40] sm:$0xff]  ;;  %v3320_v13 = vld [vmem:[#allocation5 + $0x38] sm:$0xff]  ;;  %v3332_v15 = vld [vmem:[#allocation5 + $0x28] sm:$0xff] }
  0x38   :  { %2345 = vmatprep.subr.mxu1 %v3180_v1  ;;  %2329 = vmatprep.mubr.msk.f32.mxu0 %vm111_vm2, %v95_v7  ;;  %v3338_v16 = vld [vmem:[#allocation5 + $0x20] sm:$0xff]  ;;  %v3344_v17 = vld [vmem:[#allocation5 + $0x18] sm:$0xff]  ;;  %v3350_v18 = vld [vmem:[#allocation5 + $0x10] sm:$0xff] }
  0x39   :  { %2346 = vmatpush3.msra.mxu1 %v3280_v4  ;;  %2330 = vmatmul.mubr.msk.f32.vlgmr.msra.gmra.mxu0 %vm111_vm2, %v96_v8  ;;  %v3356_v19 = vld [vmem:[#allocation5 + $0x8] sm:$0xff]  ;;  %v3362_v20 = vld [vmem:[#allocation5] sm:$0xff]  ;;  %v3422_v22 = vld [vmem:[%s4103_s3] ss:$0 sm:$0xff] }
  0x3a   :  { %2347 = vmatprep.subr.mxu1 %v3180_v1  ;;  %2376 = vmatprep.subr.mxu0 %v3180_v1  ;;  %v3427_v24 = vld [vmem:[%s4104_s4] ss:$0 sm:$0xff]  ;;  %v97_v33 = vld [vmem:[%s4100_s0 + $0x10] sm:$0xff]  ;;  %v98_v34 = vld [vmem:[%s4100_s0 + $0x18] sm:$0xff] }
  0x3b   :  { %2348 = vmatpush3.msra.mxu1 %v3284_v5  ;;  %2377 = vmatpush3.msra.mxu0 %v3274_v2  ;;  %v99_v36 = vld [vmem:[%s4100_s0 + $0x20] sm:$0xff]  ;;  %v100_v37 = vld [vmem:[%s4100_s0 + $0x28] sm:$0xff]  ;;  %v101_v38 = vld [vmem:[%s4100_s0 + $0x30] sm:$0xff] }
  0x3c   :  { %2349 = vmatprep.subr.mxu1 %v3180_v1  ;;  %2378 = vmatprep.subr.mxu0 %v3180_v1  ;;  %v102_v39 = vld [vmem:[%s4100_s0 + $0x38] sm:$0xff] }
  0x3d   :  { %2350 = vmatpush3.msra.mxu1 %v3297_v9  ;;  %2379 = vmatpush3.msra.mxu0 %v3276_v3 }
  0x3e   :  { %2351 = vmatprep.subr.mxu1 %v3180_v1  ;;  %2380 = vmatprep.subr.mxu0 %v3180_v1 }
  0x3f   :  { %2352 = vmatpush3.msra.mxu1 %v3302_v10  ;;  %2381 = vmatpush3.msra.mxu0 %v3280_v4 }
  0x40   :  { %2353 = vmatprep.subr.mxu1 %v3180_v1  ;;  %2382 = vmatprep.subr.mxu0 %v3180_v1 }
  0x41   :  { %2354 = vmatpush3.msra.mxu1 %v3308_v11  ;;  %2383 = vmatpush3.msra.mxu0 %v3284_v5 }
  0x42   :  { %2355 = vmatprep.subr.mxu1 %v3180_v1  ;;  %2384 = vmatprep.subr.mxu0 %v3180_v1 }
  0x43   :  { %2356 = vmatpush3.msra.mxu1 %v3314_v12  ;;  %2385 = vmatpush3.msra.mxu0 %v3297_v9 }
  0x44   :  { %2357 = vmatprep.subr.mxu1 %v3180_v1  ;;  %2386 = vmatprep.subr.mxu0 %v3180_v1 }
  0x45   :  { %2358 = vmatpush3.msra.mxu1 %v3320_v13  ;;  %2387 = vmatpush3.msra.mxu0 %v3302_v10 }
  0x46   :  { %2359 = vmatprep.subr.mxu1 %v3180_v1  ;;  %2388 = vmatprep.subr.mxu0 %v3180_v1 }
  0x47   :  { %2360 = vmatpush3.msra.mxu1 %v3326_v14  ;;  %2389 = vmatpush3.msra.mxu0 %v3308_v11 }
  0x48   :  { %2361 = vmatprep.subr.mxu1 %v3180_v1  ;;  %2390 = vmatprep.subr.mxu0 %v3180_v1 }
  0x49   :  { %2362 = vmatpush3.msra.mxu1 %v3332_v15  ;;  %2391 = vmatpush3.msra.mxu0 %v3314_v12 }
  0x4a   :  { %2363 = vmatprep.subr.mxu1 %v3180_v1  ;;  %2392 = vmatprep.subr.mxu0 %v3180_v1 }
  0x4b   :  { %2364 = vmatpush3.msra.mxu1 %v3338_v16  ;;  %2393 = vmatpush3.msra.mxu0 %v3320_v13 }
  0x4c   :  { %2365 = vmatprep.subr.mxu1 %v3180_v1  ;;  %2394 = vmatprep.subr.mxu0 %v3180_v1 }
  0x4d   :  { %2366 = vmatpush3.msra.mxu1 %v3344_v17  ;;  %2395 = vmatpush3.msra.mxu0 %v3326_v14 }
  0x4e   :  { %2367 = vmatprep.subr.mxu1 %v3180_v1  ;;  %2396 = vmatprep.subr.mxu0 %v3180_v1 }
  0x4f   :  { %2368 = vmatpush3.msra.mxu1 %v3350_v18  ;;  %2397 = vmatpush3.msra.mxu0 %v3332_v15 }
  0x50   :  { %2369 = vmatprep.subr.mxu1 %v3180_v1  ;;  %2398 = vmatprep.subr.mxu0 %v3180_v1 }
  0x51   :  { %2370 = vmatpush3.msra.mxu1 %v3356_v19  ;;  %2399 = vmatpush3.msra.mxu0 %v3338_v16 }
  0x52   :  { %2371 = vmatprep.subr.mxu1 %v3180_v1  ;;  %2400 = vmatprep.subr.mxu0 %v3180_v1 }
  0x53   :  { %2372 = vmatpush3.msra.mxu1 %v3362_v20  ;;  %2401 = vmatpush3.msra.mxu0 %v3344_v17 }
  0x54   :  { %2374 = vmatmul.mubr.f32.vlgmr.msra.gmra.mxu1 %v3180_v1  ;;  %2411 = vmatprep.subr.mxu1 %v3180_v1 }
  0x55   :  { %2412 = vmatpush3.msra.mxu1 %v3274_v2  ;;  %2402 = vmatprep.subr.mxu0 %v3180_v1 }
  0x56   :  { %2413 = vmatprep.subr.mxu1 %v3180_v1  ;;  %2403 = vmatpush3.msra.mxu0 %v3350_v18 }
  0x57   :  { %2414 = vmatpush3.msra.mxu1 %v3276_v3  ;;  %2404 = vmatprep.subr.mxu0 %v3180_v1 }
  0x58   :  { %2415 = vmatprep.subr.mxu1 %v3180_v1  ;;  %2405 = vmatpush3.msra.mxu0 %v3356_v19 }
  0x59   :  { %2416 = vmatpush3.msra.mxu1 %v3280_v4  ;;  %2406 = vmatprep.subr.mxu0 %v3180_v1 }
  0x5a   :  { %2417 = vmatprep.subr.mxu1 %v3180_v1  ;;  %2407 = vmatpush3.msra.mxu0 %v3362_v20 }
  0x5b   :  { %2418 = vmatpush3.msra.mxu1 %v3284_v5  ;;  %2443 = vmatprep.mubr.msk.f32.mxu1 %vm3181_vm0, %v3180_v1 }
  0x5c   :  { %2419 = vmatprep.subr.mxu1 %v3180_v1  ;;  %2446 = vmatprep.subr.mxu0 %v3180_v1 }
  0x5d   :  { %2420 = vmatpush3.msra.mxu1 %v3297_v9  ;;  %2332 = vmatprep.mubr.msk.f32.mxu0 %vm111_vm2, %v97_v33 }
  0x5e   :  { %2421 = vmatprep.subr.mxu1 %v3180_v1  ;;  %2333 = vmatmul.mubr.msk.f32.gmra.mxu0 %vm111_vm2, %v98_v34 }
  0x5f   :  { %2422 = vmatpush3.msra.mxu1 %v3302_v10  ;;  %2335 = vmatprep.mubr.msk.f32.mxu0 %vm111_vm2, %v99_v36 }
  0x60   :  { %2423 = vmatprep.subr.mxu1 %v3180_v1 }
  0x61   :  { %2424 = vmatpush3.msra.mxu1 %v3308_v11 }
  0x62   :  { %2425 = vmatprep.subr.mxu1 %v3180_v1  ;;  %2336 = vmatmul.mubr.msk.f32.gmra.mxu0 %vm111_vm2, %v100_v37 }
  0x63   :  { %2426 = vmatpush3.msra.mxu1 %v3314_v12  ;;  %2338 = vmatprep.mubr.msk.f32.mxu0 %vm111_vm2, %v101_v38 }
  0x64   :  { %2427 = vmatprep.subr.mxu1 %v3180_v1 }
  0x65   :  { %2428 = vmatpush3.msra.mxu1 %v3320_v13 }
  0x66   :  { %2429 = vmatprep.subr.mxu1 %v3180_v1  ;;  %2339 = vmatmul.mubr.msk.f32.gmra.mxu0 %vm111_vm2, %v102_v39 }
  0x67   :  { %2430 = vmatpush3.msra.mxu1 %v3326_v14  ;;  %2408 = vmatprep.mubr.msk.f32.mxu0 %vm3181_vm0, %v3180_v1 }
  0x68   :  { %2431 = vmatprep.subr.mxu1 %v3180_v1 }
  0x69   :  { %2432 = vmatpush3.msra.mxu1 %v3332_v15 }
  0x6a   :  { %2433 = vmatprep.subr.mxu1 %v3180_v1 }
  0x6b   :  { %2434 = vmatpush3.msra.mxu1 %v3338_v16 }
  0x6c   :  { %2435 = vmatprep.subr.mxu1 %v3180_v1 }
  0x6d   :  { %2436 = vmatpush3.msra.mxu1 %v3344_v17 }
  0x6e   :  { %2437 = vmatprep.subr.mxu1 %v3180_v1 }
  0x6f   :  { %2438 = vmatpush3.msra.mxu1 %v3350_v18 }
  0x70   :  { %2439 = vmatprep.subr.mxu1 %v3180_v1 }
  0x71   :  { %2440 = vmatpush3.msra.mxu1 %v3356_v19 }
  0x72   :  { %2441 = vmatprep.subr.mxu1 %v3180_v1 }
  0x73   :  { %2442 = vmatpush3.msra.mxu1 %v3362_v20 }
  0x74   :  { %2481 = vmatprep.subr.mxu1 %v3180_v1 }
  0xf9   :  { %v3417_v21 = vpop.f32.mrf.mxu0 }
  0xfa   :  { %v212_v55 = vadd.f32 %v3417_v21, %v3422_v22 }
  0xfb   :  { %v206_v23 = vpop.f32.mrf.mxu0 }
  0xfc   :  { %v207_v26 = vadd.f32 %v3422_v22, %v206_v23 }
 0x114   :  { %v343_v25 = vpop.f32.mrf.mxu1 }
 0x115   :  { %v344_v27 = vadd.f32 %v3427_v24, %v343_v25 }
 0x116   :  { %v2375_v28 = vpop.f32.mrf.mxu1 }
 0x117   :  { %v347_v29 = vadd.f32 %v344_v27, %v207_v26 }
 0x119   :  { %v1986_v30 = vmul.f32 -1.442695, %v347_v29 }
 0x11b   :  { %2990 = vpow2.f32 %v1986_v30 }
 0x11e   :  { %v3496_v48 = vpop.f32.mrf.mxu0 }
 0x120   :  { %v216_v49 = vpop.f32.mrf.mxu0 }
 0x122   :  { %v3498_v50 = vpop.f32.mrf.mxu0 }
 0x124   :  { %v3500_v51 = vpop.f32.mrf.mxu0 }
 0x126   :  { %v3502_v52 = vpop.f32.mrf.mxu0 }
 0x128   :  { %v2991_v31 = vpop.eup %2990  ;;  %v3504_v53 = vpop.f32.mrf.mxu0 }
 0x129   :  { %v351_v32 = vadd.f32 1.0, %v2991_v31 }
 0x12b   :  { %2992 = vrcp.f32 %v351_v32 }
 0x138   :  { %v2993_v35 = vpop.eup %2992 }
 0x139   :  { %354 = vrot.lane.b32.xlu0 %v2993_v35, %s3182_s12 }
 0x13d   :  { %356 = vrot.lane.b32.xlu0 %v2993_v35, %s3183_s16 }
 0x1ab   :  { %v355_v40 = vpop.permute.xlu0 %354 }
 0x1ac   :  { %v358_v41 = vmul.f32 %v355_v40, %v344_v27  ;;  %v217_v27 = vadd.f32 %v3422_v22, %v216_v49 }
 0x1ae   :  { %v359_v42 = vadd.f32 %v358_v41, %v207_v26 }
 0x1af   :  { %v357_v45 = vpop.permute.xlu0 %356 }
 0x1b0   :  { %2994 = vtanh.f32 %v359_v42 }
 0x1bd   :  { %v2995_v43 = vpop.eup %2994 }
 0x1be   :  { %v361_v44 = vsub.f32 0.0, %v2995_v43 }
 0x1c0   :  { %v362_v46 = vmul.f32 %v361_v44, %v357_v45  ;;  %v222_v44 = vadd.f32 %v3496_v48, %v3422_v22 }
 0x1c2   :  { %v3459_v47 = vadd.f32 %v2995_v43, %v362_v46 }
 0x1c4   :  { %2409 = vmatmul.mubr.f32.vlgmr.msra.gmra.mxu0 %v3459_v47 }
 0x1c5   :  { %2447 = vmatpush3.msra.mxu0 %v3274_v2  ;;  %2478 = vmatprep.mubr.msk.f32.mxu0 %vm3181_vm0, %v3180_v1 }
 0x1c6   :  { %2448 = vmatprep.subr.mxu0 %v3180_v1 }
 0x1c7   :  { %2449 = vmatpush3.msra.mxu0 %v3276_v3 }
 0x1c8   :  { %2450 = vmatprep.subr.mxu0 %v3180_v1 }
 0x1c9   :  { %2451 = vmatpush3.msra.mxu0 %v3280_v4 }
 0x1ca   :  { %2452 = vmatprep.subr.mxu0 %v3180_v1 }
 0x1cb   :  { %2453 = vmatpush3.msra.mxu0 %v3284_v5 }
 0x1cc   :  { %2454 = vmatprep.subr.mxu0 %v3180_v1 }
 0x1cd   :  { %2455 = vmatpush3.msra.mxu0 %v3297_v9 }
 0x1ce   :  { %2456 = vmatprep.subr.mxu0 %v3180_v1 }
 0x1cf   :  { %2457 = vmatpush3.msra.mxu0 %v3302_v10 }
 0x1d0   :  { %2458 = vmatprep.subr.mxu0 %v3180_v1 }
 0x1d1   :  { %2459 = vmatpush3.msra.mxu0 %v3308_v11 }
 0x1d2   :  { %2460 = vmatprep.subr.mxu0 %v3180_v1 }
 0x1d3   :  { %2461 = vmatpush3.msra.mxu0 %v3314_v12 }
 0x1d4   :  { %2462 = vmatprep.subr.mxu0 %v3180_v1 }
 0x1d5   :  { %2463 = vmatpush3.msra.mxu0 %v3320_v13 }
 0x1d6   :  { %2464 = vmatprep.subr.mxu0 %v3180_v1 }
 0x1d7   :  { %2465 = vmatpush3.msra.mxu0 %v3326_v14 }
 0x1d8   :  { %2466 = vmatprep.subr.mxu0 %v3180_v1 }
 0x1d9   :  { %2467 = vmatpush3.msra.mxu0 %v3332_v15 }
 0x1da   :  { %2468 = vmatprep.subr.mxu0 %v3180_v1 }
 0x1db   :  { %2469 = vmatpush3.msra.mxu0 %v3338_v16 }
 0x1dc   :  { %2470 = vmatprep.subr.mxu0 %v3180_v1 }
 0x1dd   :  { %2471 = vmatpush3.msra.mxu0 %v3344_v17 }
 0x1de   :  { %2472 = vmatprep.subr.mxu0 %v3180_v1 }
 0x1df   :  { %2473 = vmatpush3.msra.mxu0 %v3350_v18 }
 0x1e0   :  { %2474 = vmatprep.subr.mxu0 %v3180_v1 }
 0x1e1   :  { %2475 = vmatpush3.msra.mxu0 %v3356_v19 }
 0x1e2   :  { %2476 = vmatprep.subr.mxu0 %v3180_v1 }
 0x1e3   :  { %2477 = vmatpush3.msra.mxu0 %v3362_v20 }
 0x1e4   :  { %2516 = vmatprep.subr.mxu0 %v3180_v1 }
 0x284   :  { %v433_v54 = vpop.f32.mrf.mxu0 }
 0x285   :  { %v434_v56 = vadd.f32 %v3427_v24, %v433_v54 }
 0x286   :  { %v2410_v57 = vpop.f32.mrf.mxu0 }
 0x287   :  { %v437_v58 = vadd.f32 %v434_v56, %v212_v55 }
 0x289   :  { %v1987_v59 = vmul.f32 -1.442695, %v437_v58 }
 0x28b   :  { %2996 = vpow2.f32 %v1987_v59 }
 0x298   :  { %v2997_v60 = vpop.eup %2996 }
 0x299   :  { %v441_v61 = vadd.f32 1.0, %v2997_v60 }
 0x29b   :  { %2998 = vrcp.f32 %v441_v61 }
 0x2a8   :  { %v2999_v62 = vpop.eup %2998 }
 0x2a9   :  { %444 = vrot.lane.b32.xlu1 %v2999_v62, %s3182_s12 }
 0x2ad   :  { %446 = vrot.lane.b32.xlu1 %v2999_v62, %s3183_s16 }
 0x31b   :  { %v445_v63 = vpop.permute.xlu1 %444 }
 0x31c   :  { %v448_v0 = vmul.f32 %v445_v63, %v434_v56 }
 0x31e   :  { %v449_v6 = vadd.f32 %v448_v0, %v212_v55 }
 0x31f   :  { %v447_v21 = vpop.permute.xlu1 %446 }
 0x320   :  { %3000 = vtanh.f32 %v449_v6 }
 0x32d   :  { %v3001_v7 = vpop.eup %3000 }
 0x32e   :  { %v451_v8 = vsub.f32 %v3459_v47, %v3001_v7 }
 0x330   :  { %v452_v23 = vmul.f32 %v451_v8, %v447_v21 }
 0x332   :  { %v3512_v25 = vadd.f32 %v3001_v7, %v452_v23  ;;  %v227_v7 = vadd.f32 %v3422_v22, %v3500_v51 }
 0x334   :  { %2444 = vmatmul.mubr.f32.vlgmr.msra.gmra.mxu1 %v3512_v25 }
 0x335   :  { %2482 = vmatpush3.msra.mxu1 %v3274_v2  ;;  %2513 = vmatprep.mubr.msk.f32.mxu1 %vm3181_vm0, %v3180_v1 }
 0x336   :  { %2483 = vmatprep.subr.mxu1 %v3180_v1 }
 0x337   :  { %2484 = vmatpush3.msra.mxu1 %v3276_v3 }
 0x338   :  { %2485 = vmatprep.subr.mxu1 %v3180_v1 }
 0x339   :  { %2486 = vmatpush3.msra.mxu1 %v3280_v4 }
 0x33a   :  { %2487 = vmatprep.subr.mxu1 %v3180_v1 }
 0x33b   :  { %2488 = vmatpush3.msra.mxu1 %v3284_v5 }
 0x33c   :  { %2489 = vmatprep.subr.mxu1 %v3180_v1 }
 0x33d   :  { %2490 = vmatpush3.msra.mxu1 %v3297_v9 }
 0x33e   :  { %2491 = vmatprep.subr.mxu1 %v3180_v1 }
 0x33f   :  { %2492 = vmatpush3.msra.mxu1 %v3302_v10 }
 0x340   :  { %2493 = vmatprep.subr.mxu1 %v3180_v1 }
 0x341   :  { %2494 = vmatpush3.msra.mxu1 %v3308_v11 }
 0x342   :  { %2495 = vmatprep.subr.mxu1 %v3180_v1 }
 0x343   :  { %2496 = vmatpush3.msra.mxu1 %v3314_v12 }
 0x344   :  { %2497 = vmatprep.subr.mxu1 %v3180_v1 }
 0x345   :  { %2498 = vmatpush3.msra.mxu1 %v3320_v13 }
 0x346   :  { %2499 = vmatprep.subr.mxu1 %v3180_v1 }
 0x347   :  { %2500 = vmatpush3.msra.mxu1 %v3326_v14 }
 0x348   :  { %2501 = vmatprep.subr.mxu1 %v3180_v1 }
 0x349   :  { %2502 = vmatpush3.msra.mxu1 %v3332_v15 }
 0x34a   :  { %2503 = vmatprep.subr.mxu1 %v3180_v1 }
 0x34b   :  { %2504 = vmatpush3.msra.mxu1 %v3338_v16 }
 0x34c   :  { %2505 = vmatprep.subr.mxu1 %v3180_v1 }
 0x34d   :  { %2506 = vmatpush3.msra.mxu1 %v3344_v17 }
 0x34e   :  { %2507 = vmatprep.subr.mxu1 %v3180_v1 }
 0x34f   :  { %2508 = vmatpush3.msra.mxu1 %v3350_v18 }
 0x350   :  { %2509 = vmatprep.subr.mxu1 %v3180_v1 }
 0x351   :  { %2510 = vmatpush3.msra.mxu1 %v3356_v19 }
 0x352   :  { %2511 = vmatprep.subr.mxu1 %v3180_v1 }
 0x353   :  { %2512 = vmatpush3.msra.mxu1 %v3362_v20 }
 0x354   :  { %2551 = vmatprep.subr.mxu1 %v3180_v1 }
 0x3f4   :  { %v524_v26 = vpop.f32.mrf.mxu1 }
 0x3f5   :  { %v525_v28 = vadd.f32 %v3427_v24, %v524_v26 }
 0x3f6   :  { %v2445_v29 = vpop.f32.mrf.mxu1 }
 0x3f7   :  { %v528_v30 = vadd.f32 %v525_v28, %v217_v27 }
 0x3f9   :  { %v1988_v31 = vmul.f32 -1.442695, %v528_v30 }
 0x3fb   :  { %3002 = vpow2.f32 %v1988_v31 }
 0x408   :  { %v3003_v32 = vpop.eup %3002 }
 0x409   :  { %v532_v33 = vadd.f32 1.0, %v3003_v32 }
 0x40b   :  { %3004 = vrcp.f32 %v532_v33 }
 0x418   :  { %v3005_v34 = vpop.eup %3004 }
 0x419   :  { %537 = vrot.lane.b32.xlu1 %v3005_v34, %s3183_s16  ;;  %535 = vrot.lane.b32.xlu0 %v3005_v34, %s3182_s12 }
 0x48b   :  { %v536_v35 = vpop.permute.xlu0 %535  ;;  %v538_v40 = vpop.permute.xlu1 %537 }
 0x48c   :  { %v539_v36 = vmul.f32 %v536_v35, %v525_v28 }
 0x48e   :  { %v540_v37 = vadd.f32 %v539_v36, %v217_v27 }
 0x490   :  { %3006 = vtanh.f32 %v540_v37 }
 0x49d   :  { %v3007_v38 = vpop.eup %3006 }
 0x49e   :  { %v542_v39 = vsub.f32 %v3512_v25, %v3007_v38 }
 0x4a0   :  { %v543_v41 = vmul.f32 %v542_v39, %v538_v40  ;;  %v1023_v39 = vld [vmem:[#allocation7 + $0x68] sm:$0xff]  ;;  %v1022_v40 = vld [vmem:[#allocation7 + $0x60] sm:$0xff] }
 0x4a2   :  { %v3554_v42 = vadd.f32 %v3007_v38, %v543_v41  ;;  %v1024_v38 = vld [vmem:[#allocation7 + $0x70] sm:$0xff]  ;;  %v1021_v41 = vld [vmem:[#allocation7 + $0x58] sm:$0xff] }
 0x4a4   :  { %2479 = vmatmul.mubr.f32.vlgmr.msra.gmra.mxu0 %v3554_v42 }
 0x4a5   :  { %2517 = vmatpush3.msra.mxu0 %v3274_v2  ;;  %2548 = vmatprep.mubr.msk.f32.mxu0 %vm3181_vm0, %v3180_v1 }
 0x4a6   :  { %2518 = vmatprep.subr.mxu0 %v3180_v1 }
 0x4a7   :  { %2519 = vmatpush3.msra.mxu0 %v3276_v3 }
 0x4a8   :  { %2520 = vmatprep.subr.mxu0 %v3180_v1 }
 0x4a9   :  { %2521 = vmatpush3.msra.mxu0 %v3280_v4 }
 0x4aa   :  { %2522 = vmatprep.subr.mxu0 %v3180_v1 }
 0x4ab   :  { %2523 = vmatpush3.msra.mxu0 %v3284_v5 }
 0x4ac   :  { %2524 = vmatprep.subr.mxu0 %v3180_v1 }
 0x4ad   :  { %2525 = vmatpush3.msra.mxu0 %v3297_v9 }
 0x4ae   :  { %2526 = vmatprep.subr.mxu0 %v3180_v1 }
 0x4af   :  { %2527 = vmatpush3.msra.mxu0 %v3302_v10 }
 0x4b0   :  { %2528 = vmatprep.subr.mxu0 %v3180_v1 }
 0x4b1   :  { %2529 = vmatpush3.msra.mxu0 %v3308_v11 }
 0x4b2   :  { %2530 = vmatprep.subr.mxu0 %v3180_v1 }
 0x4b3   :  { %2531 = vmatpush3.msra.mxu0 %v3314_v12 }
 0x4b4   :  { %2532 = vmatprep.subr.mxu0 %v3180_v1 }
 0x4b5   :  { %2533 = vmatpush3.msra.mxu0 %v3320_v13 }
 0x4b6   :  { %2534 = vmatprep.subr.mxu0 %v3180_v1 }
 0x4b7   :  { %2535 = vmatpush3.msra.mxu0 %v3326_v14 }
 0x4b8   :  { %2536 = vmatprep.subr.mxu0 %v3180_v1 }
 0x4b9   :  { %2537 = vmatpush3.msra.mxu0 %v3332_v15 }
 0x4ba   :  { %2538 = vmatprep.subr.mxu0 %v3180_v1 }
 0x4bb   :  { %2539 = vmatpush3.msra.mxu0 %v3338_v16 }
 0x4bc   :  { %2540 = vmatprep.subr.mxu0 %v3180_v1 }
 0x4bd   :  { %2541 = vmatpush3.msra.mxu0 %v3344_v17 }
 0x4be   :  { %2542 = vmatprep.subr.mxu0 %v3180_v1 }
 0x4bf   :  { %2543 = vmatpush3.msra.mxu0 %v3350_v18 }
 0x4c0   :  { %2544 = vmatprep.subr.mxu0 %v3180_v1 }
 0x4c1   :  { %2545 = vmatpush3.msra.mxu0 %v3356_v19 }
 0x4c2   :  { %2546 = vmatprep.subr.mxu0 %v3180_v1 }
 0x4c3   :  { %2547 = vmatpush3.msra.mxu0 %v3362_v20 }
 0x4c4   :  { %2586 = vmatprep.subr.mxu0 %v3180_v1 }
 0x564   :  { %v615_v43 = vpop.f32.mrf.mxu0 }
 0x565   :  { %v616_v45 = vadd.f32 %v3427_v24, %v615_v43  ;;  %v1020_v43 = vld [vmem:[#allocation7 + $0x50] sm:$0xff] }
 0x566   :  { %v2480_v46 = vpop.f32.mrf.mxu0 }
 0x567   :  { %v619_v49 = vadd.f32 %v616_v45, %v222_v44  ;;  %v1017_v46 = vld [vmem:[#allocation7 + $0x38] sm:$0xff] }
 0x569   :  { %v1989_v54 = vmul.f32 -1.442695, %v619_v49  ;;  %v1015_v49 = vld [vmem:[#allocation7 + $0x28] sm:$0xff] }
 0x56b   :  { %3008 = vpow2.f32 %v1989_v54  ;;  %v1014_v54 = vld [vmem:[#allocation7 + $0x20] sm:$0xff] }
 0x578   :  { %v3009_v55 = vpop.eup %3008 }
 0x579   :  { %v623_v56 = vadd.f32 1.0, %v3009_v55  ;;  %v1013_v55 = vld [vmem:[#allocation7 + $0x18] sm:$0xff] }
 0x57b   :  { %3010 = vrcp.f32 %v623_v56  ;;  %v1012_v56 = vld [vmem:[#allocation7 + $0x10] sm:$0xff] }
 0x588   :  { %v3011_v57 = vpop.eup %3010 }
 0x589   :  { %628 = vrot.lane.b32.xlu1 %v3011_v57, %s3183_s16  ;;  %626 = vrot.lane.b32.xlu0 %v3011_v57, %s3182_s12  ;;  %v1011_v57 = vld [vmem:[#allocation7 + $0x8] sm:$0xff] }
 0x5fb   :  { %v627_v58 = vpop.permute.xlu0 %626  ;;  %v629_v62 = vpop.permute.xlu1 %628 }
 0x5fc   :  { %v630_v59 = vmul.f32 %v627_v58, %v616_v45  ;;  %v1018_v45 = vld [vmem:[#allocation7 + $0x40] sm:$0xff] }
 0x5fd   :  { %v1010_v58 = vld [vmem:[#allocation7] sm:$0xff] }
 0x5fe   :  { %v631_v60 = vadd.f32 %v630_v59, %v222_v44  ;;  %v1019_v44 = vld [vmem:[#allocation7 + $0x48] sm:$0xff] }
 0x600   :  { %3012 = vtanh.f32 %v631_v60  ;;  %v237_v60 = vadd.f32 %v3422_v22, %v3504_v53  ;;  %v3712_v53 = vld [vmem:[#allocation9 + $0x58] sm:$0xff] }
 0x60d   :  { %v3013_v61 = vpop.eup %3012 }
 0x60e   :  { %v633_v48 = vsub.f32 %v3554_v42, %v3013_v61 }
 0x610   :  { %v634_v63 = vmul.f32 %v633_v48, %v629_v62 }
 0x612   :  { %v3597_v0 = vadd.f32 %v3013_v61, %v634_v63 }
 0x614   :  { %2514 = vmatmul.mubr.f32.vlgmr.msra.gmra.mxu1 %v3597_v0 }
 0x615   :  { %2552 = vmatpush3.msra.mxu1 %v3274_v2  ;;  %2583 = vmatprep.mubr.msk.f32.mxu1 %vm3181_vm0, %v3180_v1 }
 0x616   :  { %2553 = vmatprep.subr.mxu1 %v3180_v1 }
 0x617   :  { %2554 = vmatpush3.msra.mxu1 %v3276_v3 }
 0x618   :  { %2555 = vmatprep.subr.mxu1 %v3180_v1 }
 0x619   :  { %2556 = vmatpush3.msra.mxu1 %v3280_v4 }
 0x61a   :  { %2557 = vmatprep.subr.mxu1 %v3180_v1 }
 0x61b   :  { %2558 = vmatpush3.msra.mxu1 %v3284_v5 }
 0x61c   :  { %2559 = vmatprep.subr.mxu1 %v3180_v1 }
 0x61d   :  { %2560 = vmatpush3.msra.mxu1 %v3297_v9 }
 0x61e   :  { %2561 = vmatprep.subr.mxu1 %v3180_v1 }
 0x61f   :  { %2562 = vmatpush3.msra.mxu1 %v3302_v10 }
 0x620   :  { %2563 = vmatprep.subr.mxu1 %v3180_v1 }
 0x621   :  { %2564 = vmatpush3.msra.mxu1 %v3308_v11 }
 0x622   :  { %2565 = vmatprep.subr.mxu1 %v3180_v1 }
 0x623   :  { %2566 = vmatpush3.msra.mxu1 %v3314_v12 }
 0x624   :  { %2567 = vmatprep.subr.mxu1 %v3180_v1 }
 0x625   :  { %2568 = vmatpush3.msra.mxu1 %v3320_v13 }
 0x626   :  { %2569 = vmatprep.subr.mxu1 %v3180_v1 }
 0x627   :  { %2570 = vmatpush3.msra.mxu1 %v3326_v14 }
 0x628   :  { %2571 = vmatprep.subr.mxu1 %v3180_v1 }
 0x629   :  { %2572 = vmatpush3.msra.mxu1 %v3332_v15 }
 0x62a   :  { %2573 = vmatprep.subr.mxu1 %v3180_v1 }
 0x62b   :  { %2574 = vmatpush3.msra.mxu1 %v3338_v16 }
 0x62c   :  { %2575 = vmatprep.subr.mxu1 %v3180_v1 }
 0x62d   :  { %2576 = vmatpush3.msra.mxu1 %v3344_v17 }
 0x62e   :  { %2577 = vmatprep.subr.mxu1 %v3180_v1 }
 0x62f   :  { %2578 = vmatpush3.msra.mxu1 %v3350_v18 }
 0x630   :  { %2579 = vmatprep.subr.mxu1 %v3180_v1 }
 0x631   :  { %2580 = vmatpush3.msra.mxu1 %v3356_v19 }
 0x632   :  { %2581 = vmatprep.subr.mxu1 %v3180_v1 }
 0x633   :  { %2582 = vmatpush3.msra.mxu1 %v3362_v20 }
 0x6d4   :  { %v706_v6 = vpop.f32.mrf.mxu1 }
 0x6d5   :  { %v707_v8 = vadd.f32 %v3427_v24, %v706_v6 }
 0x6d6   :  { %v2515_v21 = vpop.f32.mrf.mxu1 }
 0x6d7   :  { %v710_v23 = vadd.f32 %v707_v8, %v227_v7  ;;  %v3720_v21 = vld [vmem:[#allocation9 + $0x48] sm:$0xff] }
 0x6d9   :  { %v1990_v26 = vmul.f32 -1.442695, %v710_v23  ;;  %v3724_v23 = vld [vmem:[#allocation9 + $0x40] sm:$0xff] }
 0x6db   :  { %3014 = vpow2.f32 %v1990_v26  ;;  %v3728_v26 = vld [vmem:[#allocation9 + $0x38] sm:$0xff] }
 0x6e8   :  { %v3015_v27 = vpop.eup %3014 }
 0x6e9   :  { %v714_v28 = vadd.f32 1.0, %v3015_v27  ;;  %v3732_v27 = vld [vmem:[#allocation9 + $0x30] sm:$0xff] }
 0x6eb   :  { %3016 = vrcp.f32 %v714_v28  ;;  %v3736_v28 = vld [vmem:[#allocation9 + $0x28] sm:$0xff] }
 0x6f8   :  { %v3017_v29 = vpop.eup %3016 }
 0x6f9   :  { %719 = vrot.lane.b32.xlu1 %v3017_v29, %s3183_s16  ;;  %717 = vrot.lane.b32.xlu0 %v3017_v29, %s3182_s12  ;;  %v3740_v29 = vld [vmem:[#allocation9 + $0x20] sm:$0xff] }
 0x76b   :  { %v718_v30 = vpop.permute.xlu0 %717  ;;  %v720_v34 = vpop.permute.xlu1 %719 }
 0x76c   :  { %v721_v31 = vmul.f32 %v718_v30, %v707_v8  ;;  %v3716_v8 = vld [vmem:[#allocation9 + $0x50] sm:$0xff]  ;;  %v3744_v30 = vld [vmem:[#allocation9 + $0x18] sm:$0xff] }
 0x76e   :  { %v722_v32 = vadd.f32 %v721_v31, %v227_v7  ;;  %v3700_v7 = vld [vmem:[#allocation9 + $0x70] sm:$0xff] }
 0x76f   :  { %v3748_v31 = vld [vmem:[#allocation9 + $0x10] sm:$0xff] }
 0x770   :  { %3018 = vtanh.f32 %v722_v32  ;;  %v3752_v32 = vld [vmem:[#allocation9 + $0x8] sm:$0xff] }
 0x77d   :  { %v3019_v33 = vpop.eup %3018 }
 0x77e   :  { %v724_v51 = vsub.f32 %v3597_v0, %v3019_v33 }
 0x780   :  { %v725_v35 = vmul.f32 %v724_v51, %v720_v34 }
 0x782   :  { %v3639_v36 = vadd.f32 %v3019_v33, %v725_v35  ;;  %v3756_v33 = vld [vmem:[#allocation9] sm:$0xff] }
 0x784   :  { %2549 = vmatmul.mubr.f32.vlgmr.msra.gmra.mxu0 %v3639_v36 }
 0x785   :  { %2587 = vmatpush3.msra.mxu0 %v3274_v2  ;;  %2618 = vmatprep.mubr.msk.f32.mxu0 %vm3181_vm0, %v3180_v1 }
 0x786   :  { %2588 = vmatprep.subr.mxu0 %v3180_v1 }
 0x787   :  { %2589 = vmatpush3.msra.mxu0 %v3276_v3  ;;  %v232_v3 = vadd.f32 %v3498_v50, %v3422_v22  ;;  %v3704_v22 = vld [vmem:[#allocation9 + $0x68] sm:$0xff] }
 0x788   :  { %2590 = vmatprep.subr.mxu0 %v3180_v1 }
 0x789   :  { %2591 = vmatpush3.msra.mxu0 %v3280_v4 }
 0x78a   :  { %2592 = vmatprep.subr.mxu0 %v3180_v1 }
 0x78b   :  { %2593 = vmatpush3.msra.mxu0 %v3284_v5 }
 0x78c   :  { %2594 = vmatprep.subr.mxu0 %v3180_v1 }
 0x78d   :  { %2595 = vmatpush3.msra.mxu0 %v3297_v9 }
 0x78e   :  { %2596 = vmatprep.subr.mxu0 %v3180_v1 }
 0x78f   :  { %2597 = vmatpush3.msra.mxu0 %v3302_v10 }
 0x790   :  { %2598 = vmatprep.subr.mxu0 %v3180_v1 }
 0x791   :  { %2599 = vmatpush3.msra.mxu0 %v3308_v11 }
 0x792   :  { %2600 = vmatprep.subr.mxu0 %v3180_v1 }
 0x793   :  { %2601 = vmatpush3.msra.mxu0 %v3314_v12 }
 0x794   :  { %2602 = vmatprep.subr.mxu0 %v3180_v1 }
 0x795   :  { %2603 = vmatpush3.msra.mxu0 %v3320_v13  ;;  %v1025_v13 = vld [vmem:[#allocation7 + $0x78] sm:$0xff] }
 0x796   :  { %2604 = vmatprep.subr.mxu0 %v3180_v1  ;;  %2621 = vmatprep.subr.mxu1 %v1025_v13 }
 0x797   :  { %2605 = vmatpush3.msra.mxu0 %v3326_v14 }
 0x798   :  { %2606 = vmatprep.subr.mxu0 %v3180_v1 }
 0x799   :  { %2607 = vmatpush3.msra.mxu0 %v3332_v15 }
 0x79a   :  { %2608 = vmatprep.subr.mxu0 %v3180_v1 }
 0x79b   :  { %2609 = vmatpush3.msra.mxu0 %v3338_v16 }
 0x79c   :  { %2610 = vmatprep.subr.mxu0 %v3180_v1 }
 0x79d   :  { %2611 = vmatpush3.msra.mxu0 %v3344_v17 }
 0x79e   :  { %2612 = vmatprep.subr.mxu0 %v3180_v1 }
 0x79f   :  { %2613 = vmatpush3.msra.mxu0 %v3350_v18 }
 0x7a0   :  { %2614 = vmatprep.subr.mxu0 %v3180_v1 }
 0x7a1   :  { %2615 = vmatpush3.msra.mxu0 %v3356_v19 }
 0x7a2   :  { %2616 = vmatprep.subr.mxu0 %v3180_v1 }
 0x7a3   :  { %2617 = vmatpush3.msra.mxu0 %v3362_v20 }
 0x7a4   :  { %2665 = vmatprep.subr.mxu0 %v3180_v1 }
 0x844   :  { %v797_v2 = vpop.f32.mrf.mxu0 }
 0x845   :  { %v798_v4 = vadd.f32 %v3427_v24, %v797_v2 }
 0x846   :  { %v2550_v5 = vpop.f32.mrf.mxu0 }
 0x847   :  { %v801_v9 = vadd.f32 %v798_v4, %v232_v3 }
 0x849   :  { %v1991_v10 = vmul.f32 -1.442695, %v801_v9 }
 0x84b   :  { %3020 = vpow2.f32 %v1991_v10  ;;  %v3086_v10 = vld [vmem:[%s4103_s3] ss:$0 sm:$0xff] }
 0x858   :  { %v3021_v11 = vpop.eup %3020 }
 0x859   :  { %v805_v12 = vadd.f32 1.0, %v3021_v11  ;;  %v242_v11 = vadd.f32 %v3086_v10, %v3502_v52  ;;  %v3852_v52 = vld [vmem:[%s4107_s7] ss:$0 sm:$0xff] }
 0x85b   :  { %3022 = vrcp.f32 %v805_v12  ;;  %v3087_v12 = vld [vmem:[%s4104_s4] ss:$0 sm:$0xff] }
 0x868   :  { %v3023_v14 = vpop.eup %3022 }
 0x869   :  { %810 = vrot.lane.b32.xlu1 %v3023_v14, %s3183_s16  ;;  %808 = vrot.lane.b32.xlu0 %v3023_v14, %s3182_s12 }
 0x8db   :  { %v809_v15 = vpop.permute.xlu0 %808  ;;  %v811_v20 = vpop.permute.xlu1 %810 }
 0x8dc   :  { %v812_v16 = vmul.f32 %v809_v15, %v798_v4 }
 0x8de   :  { %v813_v17 = vadd.f32 %v812_v16, %v232_v3 }
 0x8e0   :  { %3024 = vtanh.f32 %v813_v17 }
 0x8ed   :  { %v3025_v18 = vpop.eup %3024 }
 0x8ee   :  { %v815_v19 = vsub.f32 %v3639_v36, %v3025_v18 }
 0x8f0   :  { %v816_v50 = vmul.f32 %v815_v19, %v811_v20 }
 0x8f2   :  { %v3682_v37 = vadd.f32 %v3025_v18, %v816_v50  ;;  %v3847_v50 = vld [vmem:[%s4108_s8] ss:$0 sm:$0xff] }
 0x8f4   :  { %2584 = vmatmul.mubr.f32.vlgmr.msra.gmra.mxu1 %v3682_v37 }
 0x8f5   :  { %2622 = vmatpush3.msra.mxu1 %v1025_v13  ;;  %2653 = vmatprep.mubr.f32.mxu1 %v3459_v47  ;;  %v1016_v47 = vld [vmem:[#allocation7 + $0x30] sm:$0xff] }
 0x8f6   :  { %2623 = vmatprep.subr.mxu1 %v1024_v38 }
 0x8f7   :  { %2624 = vmatpush3.msra.mxu1 %v1024_v38 }
 0x8f8   :  { %2625 = vmatprep.subr.mxu1 %v1023_v39 }
 0x8f9   :  { %2626 = vmatpush3.msra.mxu1 %v1023_v39 }
 0x8fa   :  { %2627 = vmatprep.subr.mxu1 %v1022_v40 }
 0x8fb   :  { %2628 = vmatpush3.msra.mxu1 %v1022_v40 }
 0x8fc   :  { %2629 = vmatprep.subr.mxu1 %v1021_v41 }
 0x8fd   :  { %2630 = vmatpush3.msra.mxu1 %v1021_v41 }
 0x8fe   :  { %2631 = vmatprep.subr.mxu1 %v1020_v43 }
 0x8ff   :  { %2632 = vmatpush3.msra.mxu1 %v1020_v43 }
 0x900   :  { %2633 = vmatprep.subr.mxu1 %v1019_v44 }
 0x901   :  { %2634 = vmatpush3.msra.mxu1 %v1019_v44 }
 0x902   :  { %2635 = vmatprep.subr.mxu1 %v1018_v45 }
 0x903   :  { %2636 = vmatpush3.msra.mxu1 %v1018_v45 }
 0x904   :  { %2637 = vmatprep.subr.mxu1 %v1017_v46 }
 0x905   :  { %2638 = vmatpush3.msra.mxu1 %v1017_v46 }
 0x906   :  { %2639 = vmatprep.subr.mxu1 %v1016_v47 }
 0x907   :  { %2640 = vmatpush3.msra.mxu1 %v1016_v47 }
 0x908   :  { %2641 = vmatprep.subr.mxu1 %v1015_v49 }
 0x909   :  { %2642 = vmatpush3.msra.mxu1 %v1015_v49 }
 0x90a   :  { %2643 = vmatprep.subr.mxu1 %v1014_v54 }
 0x90b   :  { %2644 = vmatpush3.msra.mxu1 %v1014_v54 }
 0x90c   :  { %2645 = vmatprep.subr.mxu1 %v1013_v55 }
 0x90d   :  { %2646 = vmatpush3.msra.mxu1 %v1013_v55 }
 0x90e   :  { %2647 = vmatprep.subr.mxu1 %v1012_v56 }
 0x90f   :  { %2648 = vmatpush3.msra.mxu1 %v1012_v56 }
 0x910   :  { %2649 = vmatprep.subr.mxu1 %v1011_v57 }
 0x911   :  { %2650 = vmatpush3.msra.mxu1 %v1011_v57 }
 0x912   :  { %2651 = vmatprep.subr.mxu1 %v1010_v58 }
 0x913   :  { %2652 = vmatpush3.msra.mxu1 %v1010_v58 }
 0x914   :  { %2654 = vmatmul.mubr.f32.vlgmr.msra.gmra.mxu1 %v3512_v25  ;;  %2700 = vmatprep.subr.mxu1 %v3180_v1 }
 0x915   :  { %2656 = vmatprep.mubr.f32.mxu1 %v3554_v42 }
 0x918   :  { %2657 = vmatmul.mubr.f32.gmra.mxu1 %v3597_v0  ;;  %v3697_v0 = vld [vmem:[#allocation9 + $0x78] sm:$0xff] }
 0x919   :  { %2659 = vmatprep.mubr.f32.mxu1 %v3639_v36  ;;  %2701 = vmatpush3.msra.mxu1 %v3697_v0 }
 0x91a   :  { %2702 = vmatprep.subr.mxu1 %v3180_v1 }
 0x91b   :  { %2703 = vmatpush3.msra.mxu1 %v3700_v7 }
 0x91c   :  { %2660 = vmatmul.mubr.f32.gmra.mxu1 %v3682_v37  ;;  %2704 = vmatprep.subr.mxu1 %v3180_v1 }
 0x91d   :  { %2705 = vmatpush3.msra.mxu1 %v3704_v22 }
 0x91e   :  { %2706 = vmatprep.subr.mxu1 %v3180_v1 }
 0x9b4   :  { %v888_v59 = vpop.f32.mrf.mxu1 }
 0x9b5   :  { %v889_v61 = vadd.f32 %v3427_v24, %v888_v59  ;;  %v3708_v24 = vld [vmem:[#allocation9 + $0x60] sm:$0xff] }
 0x9b6   :  { %v2585_v48 = vpop.f32.mrf.mxu1  ;;  %2707 = vmatpush3.msra.mxu1 %v3708_v24 }
 0x9b7   :  { %v892_v62 = vadd.f32 %v889_v61, %v237_v60  ;;  %2708 = vmatprep.subr.mxu1 %v3180_v1 }
 0x9b8   :  { %2709 = vmatpush3.msra.mxu1 %v3712_v53 }
 0x9b9   :  { %v1992_v63 = vmul.f32 -1.442695, %v892_v62  ;;  %2710 = vmatprep.subr.mxu1 %v3180_v1 }
 0x9ba   :  { %2711 = vmatpush3.msra.mxu1 %v3716_v8 }
 0x9bb   :  { %3026 = vpow2.f32 %v1992_v63  ;;  %2712 = vmatprep.subr.mxu1 %v3180_v1 }
 0x9bc   :  { %2713 = vmatpush3.msra.mxu1 %v3720_v21 }
 0x9bd   :  { %2714 = vmatprep.subr.mxu1 %v3180_v1 }
 0x9be   :  { %2715 = vmatpush3.msra.mxu1 %v3724_v23 }
 0x9bf   :  { %2716 = vmatprep.subr.mxu1 %v3180_v1 }
 0x9c0   :  { %2717 = vmatpush3.msra.mxu1 %v3728_v26 }
 0x9c1   :  { %2718 = vmatprep.subr.mxu1 %v3180_v1 }
 0x9c2   :  { %2719 = vmatpush3.msra.mxu1 %v3732_v27 }
 0x9c3   :  { %2720 = vmatprep.subr.mxu1 %v3180_v1 }
 0x9c4   :  { %2721 = vmatpush3.msra.mxu1 %v3736_v28 }
 0x9c5   :  { %2722 = vmatprep.subr.mxu1 %v3180_v1 }
 0x9c6   :  { %2723 = vmatpush3.msra.mxu1 %v3740_v29 }
 0x9c7   :  { %2724 = vmatprep.subr.mxu1 %v3180_v1 }
 0x9c8   :  { %v3027_v25 = vpop.eup %3026  ;;  %2725 = vmatpush3.msra.mxu1 %v3744_v30 }
 0x9c9   :  { %v896_v6 = vadd.f32 1.0, %v3027_v25  ;;  %2726 = vmatprep.subr.mxu1 %v3180_v1 }
 0x9ca   :  { %2727 = vmatpush3.msra.mxu1 %v3748_v31 }
 0x9cb   :  { %3028 = vrcp.f32 %v896_v6  ;;  %2728 = vmatprep.subr.mxu1 %v3180_v1 }
 0x9cc   :  { %2729 = vmatpush3.msra.mxu1 %v3752_v32 }
 0x9cd   :  { %2730 = vmatprep.subr.mxu1 %v3180_v1 }
 0x9ce   :  { %2731 = vmatpush3.msra.mxu1 %v3756_v33 }
 0x9cf   :  { %2770 = vmatprep.subr.mxu1 %v3180_v1 }
 0x9d4   :  { %v3842_v19 = vpop.f32.mrf.mxu1 }
 0x9d6   :  { %v1099_v20 = vpop.f32.mrf.mxu1 }
 0x9d7   :  { %v1100_v38 = vadd.f32 %v3852_v52, %v1099_v20 }
 0x9d8   :  { %v3029_v42 = vpop.eup %3028 }
 0x9d9   :  { %901 = vrot.lane.b32.xlu1 %v3029_v42, %s3183_s16  ;;  %899 = vrot.lane.b32.xlu0 %v3029_v42, %s3182_s12 }
 0xa4b   :  { %v900_v51 = vpop.permute.xlu0 %899  ;;  %v902_v3 = vpop.permute.xlu1 %901 }
 0xa4c   :  { %v903_v34 = vmul.f32 %v900_v51, %v889_v61 }
 0xa4e   :  { %v904_v35 = vadd.f32 %v903_v34, %v237_v60  ;;  %v3897_v34 = vpop.f32.mrf.mxu1 }
 0xa50   :  { %3030 = vtanh.f32 %v904_v35  ;;  %v1109_v35 = vpop.f32.mrf.mxu1 }
 0xa5d   :  { %v3031_v36 = vpop.eup %3030 }
 0xa5e   :  { %v906_v2 = vsub.f32 %v3682_v37, %v3031_v36 }
 0xa60   :  { %v907_v4 = vmul.f32 %v906_v2, %v902_v3 }
 0xa62   :  { %v3762_v5 = vadd.f32 %v3031_v36, %v907_v4  ;;  %v3899_v36 = vpop.f32.mrf.mxu1 }
 0xa64   :  { %2619 = vmatmul.mubr.f32.vlgmr.msra.gmra.mxu0 %v3762_v5  ;;  %2662 = vmatprep.mubr.f32.mxu1 %v3762_v5  ;;  %v3901_v2 = vpop.f32.mrf.mxu1 }
 0xa65   :  { %2666 = vmatpush3.msra.mxu0 %v3697_v0  ;;  %2697 = vmatprep.mubr.msk.f32.mxu0 %vm3181_vm0, %v3180_v1 }
 0xa66   :  { %2667 = vmatprep.subr.mxu0 %v3180_v1 }
 0xa67   :  { %2668 = vmatpush3.msra.mxu0 %v3700_v7 }
 0xa68   :  { %2669 = vmatprep.subr.mxu0 %v3180_v1 }
 0xa69   :  { %2670 = vmatpush3.msra.mxu0 %v3704_v22 }
 0xa6a   :  { %2671 = vmatprep.subr.mxu0 %v3180_v1 }
 0xa6b   :  { %2672 = vmatpush3.msra.mxu0 %v3708_v24 }
 0xa6c   :  { %2673 = vmatprep.subr.mxu0 %v3180_v1 }
 0xa6d   :  { %2674 = vmatpush3.msra.mxu0 %v3712_v53 }
 0xa6e   :  { %2675 = vmatprep.subr.mxu0 %v3180_v1 }
 0xa6f   :  { %2676 = vmatpush3.msra.mxu0 %v3716_v8 }
 0xa70   :  { %2677 = vmatprep.subr.mxu0 %v3180_v1 }
 0xa71   :  { %2678 = vmatpush3.msra.mxu0 %v3720_v21 }
 0xa72   :  { %2679 = vmatprep.subr.mxu0 %v3180_v1 }
 0xa73   :  { %2680 = vmatpush3.msra.mxu0 %v3724_v23 }
 0xa74   :  { %2681 = vmatprep.subr.mxu0 %v3180_v1 }
 0xa75   :  { %2682 = vmatpush3.msra.mxu0 %v3728_v26 }
 0xa76   :  { %2683 = vmatprep.subr.mxu0 %v3180_v1 }
 0xa77   :  { %2684 = vmatpush3.msra.mxu0 %v3732_v27 }
 0xa78   :  { %2685 = vmatprep.subr.mxu0 %v3180_v1 }
 0xa79   :  { %2686 = vmatpush3.msra.mxu0 %v3736_v28 }
 0xa7a   :  { %2687 = vmatprep.subr.mxu0 %v3180_v1 }
 0xa7b   :  { %2688 = vmatpush3.msra.mxu0 %v3740_v29 }
 0xa7c   :  { %2689 = vmatprep.subr.mxu0 %v3180_v1 }
 0xa7d   :  { %2690 = vmatpush3.msra.mxu0 %v3744_v30 }
 0xa7e   :  { %2691 = vmatprep.subr.mxu0 %v3180_v1 }
 0xa7f   :  { %2692 = vmatpush3.msra.mxu0 %v3748_v31 }
 0xa80   :  { %2693 = vmatprep.subr.mxu0 %v3180_v1 }
 0xa81   :  { %2694 = vmatpush3.msra.mxu0 %v3752_v32 }
 0xa82   :  { %2695 = vmatprep.subr.mxu0 %v3180_v1 }
 0xa83   :  { %2696 = vmatpush3.msra.mxu0 %v3756_v33 }
 0xa84   :  { %2698 = vmatmul.mubr.f32.vlgmr.msra.gmra.mxu0 %v3180_v1  ;;  %2735 = vmatprep.subr.mxu0 %v3180_v1 }
 0xa85   :  { %2736 = vmatpush3.msra.mxu0 %v3697_v0  ;;  %2767 = vmatprep.mubr.msk.f32.mxu0 %vm3181_vm0, %v3180_v1 }
 0xa86   :  { %2737 = vmatprep.subr.mxu0 %v3180_v1 }
 0xa87   :  { %2738 = vmatpush3.msra.mxu0 %v3700_v7 }
 0xa88   :  { %2739 = vmatprep.subr.mxu0 %v3180_v1 }
 0xa89   :  { %2740 = vmatpush3.msra.mxu0 %v3704_v22 }
 0xa8a   :  { %2741 = vmatprep.subr.mxu0 %v3180_v1 }
 0xa8b   :  { %2742 = vmatpush3.msra.mxu0 %v3708_v24 }
 0xa8c   :  { %2743 = vmatprep.subr.mxu0 %v3180_v1 }
 0xa8d   :  { %2744 = vmatpush3.msra.mxu0 %v3712_v53 }
 0xa8e   :  { %2745 = vmatprep.subr.mxu0 %v3180_v1 }
 0xa8f   :  { %2746 = vmatpush3.msra.mxu0 %v3716_v8 }
 0xa90   :  { %2747 = vmatprep.subr.mxu0 %v3180_v1 }
 0xa91   :  { %2748 = vmatpush3.msra.mxu0 %v3720_v21 }
 0xa92   :  { %2749 = vmatprep.subr.mxu0 %v3180_v1 }
 0xa93   :  { %2750 = vmatpush3.msra.mxu0 %v3724_v23 }
 0xa94   :  { %2751 = vmatprep.subr.mxu0 %v3180_v1 }
 0xa95   :  { %2752 = vmatpush3.msra.mxu0 %v3728_v26 }
 0xa96   :  { %2753 = vmatprep.subr.mxu0 %v3180_v1 }
 0xa97   :  { %2754 = vmatpush3.msra.mxu0 %v3732_v27 }
 0xa98   :  { %2755 = vmatprep.subr.mxu0 %v3180_v1 }
 0xa99   :  { %2756 = vmatpush3.msra.mxu0 %v3736_v28 }
 0xa9a   :  { %2757 = vmatprep.subr.mxu0 %v3180_v1 }
 0xa9b   :  { %2758 = vmatpush3.msra.mxu0 %v3740_v29 }
 0xa9c   :  { %2759 = vmatprep.subr.mxu0 %v3180_v1 }
 0xa9d   :  { %2760 = vmatpush3.msra.mxu0 %v3744_v30 }
 0xa9e   :  { %2761 = vmatprep.subr.mxu0 %v3180_v1 }
 0xa9f   :  { %2762 = vmatpush3.msra.mxu0 %v3748_v31 }
 0xaa0   :  { %2763 = vmatprep.subr.mxu0 %v3180_v1 }
 0xaa1   :  { %2764 = vmatpush3.msra.mxu0 %v3752_v32 }
 0xaa2   :  { %2765 = vmatprep.subr.mxu0 %v3180_v1 }
 0xaa3   :  { %2766 = vmatpush3.msra.mxu0 %v3756_v33 }
 0xaa4   :  { %2805 = vmatprep.subr.mxu0 %v3180_v1 }
 0xb24   :  { %v979_v9 = vpop.f32.mrf.mxu0 }
 0xb25   :  { %v980_v13 = vadd.f32 %v3087_v12, %v979_v9  ;;  %v1105_v9 = vadd.f32 %v3842_v19, %v3852_v52 }
 0xb26   :  { %v2620_v14 = vpop.f32.mrf.mxu0 }
 0xb27   :  { %v983_v15 = vadd.f32 %v980_v13, %v242_v11 }
 0xb29   :  { %v1993_v16 = vmul.f32 -1.442695, %v983_v15 }
 0xb2b   :  { %3032 = vpow2.f32 %v1993_v16 }
 0xb38   :  { %v3033_v17 = vpop.eup %3032 }
 0xb39   :  { %v987_v18 = vadd.f32 1.0, %v3033_v17 }
 0xb3b   :  { %3034 = vrcp.f32 %v987_v18 }
 0xb44   :  { %v1236_v37 = vpop.f32.mrf.mxu0 }
 0xb45   :  { %v1237_v39 = vadd.f32 %v3847_v50, %v1236_v37 }
 0xb46   :  { %v2699_v40 = vpop.f32.mrf.mxu0 }
 0xb47   :  { %v1240_v41 = vadd.f32 %v1237_v39, %v1100_v38 }
 0xb48   :  { %v3035_v43 = vpop.eup %3034 }
 0xb49   :  { %v1996_v44 = vmul.f32 -1.442695, %v1240_v41  ;;  %990 = vrot.lane.b32.xlu0 %v3035_v43, %s3182_s12 }
 0xb4b   :  { %3036 = vpow2.f32 %v1996_v44 }
 0xb4d   :  { %992 = vrot.lane.b32.xlu0 %v3035_v43, %s3183_s16  ;;  %v1110_v43 = vadd.f32 %v3852_v52, %v1109_v35 }
 0xb58   :  { %v3037_v45 = vpop.eup %3036 }
 0xb59   :  { %v1244_v46 = vadd.f32 1.0, %v3037_v45 }
 0xb5b   :  { %3038 = vrcp.f32 %v1244_v46 }
 0xb68   :  { %v3039_v47 = vpop.eup %3038 }
 0xb69   :  { %1247 = vrot.lane.b32.xlu1 %v3039_v47, %s3182_s12 }
 0xb6d   :  { %1249 = vrot.lane.b32.xlu1 %v3039_v47, %s3183_s16 }
 0xbbb   :  { %v991_v49 = vpop.permute.xlu0 %990 }
 0xbbc   :  { %v994_v54 = vmul.f32 %v991_v49, %v980_v13 }
 0xbbe   :  { %v995_v55 = vadd.f32 %v994_v54, %v242_v11 }
 0xbbf   :  { %v993_v58 = vpop.permute.xlu0 %992 }
 0xbc0   :  { %3040 = vtanh.f32 %v995_v55 }
 0xbcd   :  { %v3041_v56 = vpop.eup %3040 }
 0xbce   :  { %v997_v57 = vsub.f32 %v3762_v5, %v3041_v56 }
 0xbd0   :  { %v998_v59 = vmul.f32 %v997_v57, %v993_v58 }
 0xbd2   :  { %v999_v60 = vadd.f32 %v3041_v56, %v998_v59 }
 0xbd4   :  { %2663 = vmatmul.mubr.f32.gmra.mxu1 %v999_v60 }
 0xbd5   :  { %2732 = vmatprep.mubr.msk.f32.mxu1 %vm3181_vm0, %v3180_v1 }
 0xbdb   :  { %v1248_v61 = vpop.permute.xlu1 %1247 }
 0xbdc   :  { %v1251_v48 = vmul.f32 %v1248_v61, %v1237_v39 }
 0xbde   :  { %v1252_v62 = vadd.f32 %v1251_v48, %v1100_v38 }
 0xbdf   :  { %v1250_v6 = vpop.permute.xlu1 %1249 }
 0xbe0   :  { %3042 = vtanh.f32 %v1252_v62 }
 0xbed   :  { %v3043_v63 = vpop.eup %3042 }
 0xbee   :  { %v1254_v25 = vsub.f32 0.0, %v3043_v63 }
 0xbf0   :  { %v1255_v42 = vmul.f32 %v1254_v25, %v1250_v6  ;;  %v1115_v25 = vadd.f32 %v3897_v34, %v3852_v52 }
 0xbf2   :  { %v1256_v51 = vadd.f32 %v3043_v63, %v1255_v42 }
 0xbf4   :  { %2733 = vmatmul.mubr.f32.vlgmr.msra.gmra.mxu1 %v1256_v51 }
 0xbf5   :  { %2771 = vmatpush3.msra.mxu1 %v3697_v0  ;;  %2802 = vmatprep.mubr.msk.f32.mxu1 %vm3181_vm0, %v3180_v1 }
 0xbf6   :  { %2772 = vmatprep.subr.mxu1 %v3180_v1 }
 0xbf7   :  { %2773 = vmatpush3.msra.mxu1 %v3700_v7 }
 0xbf8   :  { %2774 = vmatprep.subr.mxu1 %v3180_v1 }
 0xbf9   :  { %2775 = vmatpush3.msra.mxu1 %v3704_v22 }
 0xbfa   :  { %2776 = vmatprep.subr.mxu1 %v3180_v1 }
 0xbfb   :  { %2777 = vmatpush3.msra.mxu1 %v3708_v24 }
 0xbfc   :  { %2778 = vmatprep.subr.mxu1 %v3180_v1 }
 0xbfd   :  { %2779 = vmatpush3.msra.mxu1 %v3712_v53 }
 0xbfe   :  { %2780 = vmatprep.subr.mxu1 %v3180_v1 }
 0xbff   :  { %2781 = vmatpush3.msra.mxu1 %v3716_v8 }
 0xc00   :  { %2782 = vmatprep.subr.mxu1 %v3180_v1 }
 0xc01   :  { %2783 = vmatpush3.msra.mxu1 %v3720_v21 }
 0xc02   :  { %2784 = vmatprep.subr.mxu1 %v3180_v1 }
 0xc03   :  { %2785 = vmatpush3.msra.mxu1 %v3724_v23 }
 0xc04   :  { %2786 = vmatprep.subr.mxu1 %v3180_v1 }
 0xc05   :  { %2787 = vmatpush3.msra.mxu1 %v3728_v26 }
 0xc06   :  { %2788 = vmatprep.subr.mxu1 %v3180_v1 }
 0xc07   :  { %2789 = vmatpush3.msra.mxu1 %v3732_v27 }
 0xc08   :  { %2790 = vmatprep.subr.mxu1 %v3180_v1 }
 0xc09   :  { %2791 = vmatpush3.msra.mxu1 %v3736_v28 }
 0xc0a   :  { %2792 = vmatprep.subr.mxu1 %v3180_v1 }
 0xc0b   :  { %2793 = vmatpush3.msra.mxu1 %v3740_v29 }
 0xc0c   :  { %2794 = vmatprep.subr.mxu1 %v3180_v1 }
 0xc0d   :  { %2795 = vmatpush3.msra.mxu1 %v3744_v30 }
 0xc0e   :  { %2796 = vmatprep.subr.mxu1 %v3180_v1 }
 0xc0f   :  { %2797 = vmatpush3.msra.mxu1 %v3748_v31 }
 0xc10   :  { %2798 = vmatprep.subr.mxu1 %v3180_v1 }
 0xc11   :  { %2799 = vmatpush3.msra.mxu1 %v3752_v32 }
 0xc12   :  { %2800 = vmatprep.subr.mxu1 %v3180_v1 }
 0xc13   :  { %2801 = vmatpush3.msra.mxu1 %v3756_v33 }
 0xc14   :  { %2840 = vmatprep.subr.mxu1 %v3180_v1 }
 0xc94   :  { %v3903_v3 = vpop.f32.mrf.mxu1 }
 0xc96   :  { %v3905_v4 = vpop.f32.mrf.mxu1 }
 0xcb4   :  { %v1324_v5 = vpop.f32.mrf.mxu1 }
 0xcb5   :  { %v1325_v10 = vadd.f32 %v3847_v50, %v1324_v5 }
 0xcb6   :  { %v2734_v11 = vpop.f32.mrf.mxu1 }
 0xcb7   :  { %v1328_v12 = vadd.f32 %v1325_v10, %v1105_v9 }
 0xcb9   :  { %v1997_v13 = vmul.f32 -1.442695, %v1328_v12 }
 0xcbb   :  { %3044 = vpow2.f32 %v1997_v13 }
 0xcc8   :  { %v3045_v14 = vpop.eup %3044 }
 0xcc9   :  { %v1332_v15 = vadd.f32 1.0, %v3045_v14 }
 0xccb   :  { %3046 = vrcp.f32 %v1332_v15 }
 0xcd8   :  { %v3047_v16 = vpop.eup %3046 }
 0xcd9   :  { %1337 = vrot.lane.b32.xlu1 %v3047_v16, %s3183_s16  ;;  %1335 = vrot.lane.b32.xlu0 %v3047_v16, %s3182_s12 }
 0xd4b   :  { %v1336_v17 = vpop.permute.xlu0 %1335  ;;  %v1338_v38 = vpop.permute.xlu1 %1337 }
 0xd4c   :  { %v1339_v18 = vmul.f32 %v1336_v17, %v1325_v10 }
 0xd4e   :  { %v1340_v20 = vadd.f32 %v1339_v18, %v1105_v9 }
 0xd50   :  { %3048 = vtanh.f32 %v1340_v20  ;;  %v1120_v20 = vadd.f32 %v3852_v52, %v3901_v2 }
 0xd5d   :  { %v3049_v37 = vpop.eup %3048 }
 0xd5e   :  { %v1342_v19 = vsub.f32 %v1256_v51, %v3049_v37 }
 0xd60   :  { %v1343_v39 = vmul.f32 %v1342_v19, %v1338_v38 }
 0xd62   :  { %v1344_v40 = vadd.f32 %v3049_v37, %v1343_v39 }
 0xd64   :  { %2768 = vmatmul.mubr.f32.vlgmr.msra.gmra.mxu0 %v1344_v40 }
 0xd65   :  { %2806 = vmatpush3.msra.mxu0 %v3697_v0  ;;  %2837 = vmatprep.mubr.msk.f32.mxu0 %vm3181_vm0, %v3180_v1 }
 0xd66   :  { %2807 = vmatprep.subr.mxu0 %v3180_v1 }
 0xd67   :  { %2808 = vmatpush3.msra.mxu0 %v3700_v7 }
 0xd68   :  { %2809 = vmatprep.subr.mxu0 %v3180_v1 }
 0xd69   :  { %2810 = vmatpush3.msra.mxu0 %v3704_v22 }
 0xd6a   :  { %2811 = vmatprep.subr.mxu0 %v3180_v1 }
 0xd6b   :  { %2812 = vmatpush3.msra.mxu0 %v3708_v24 }
 0xd6c   :  { %2813 = vmatprep.subr.mxu0 %v3180_v1 }
 0xd6d   :  { %2814 = vmatpush3.msra.mxu0 %v3712_v53 }
 0xd6e   :  { %2815 = vmatprep.subr.mxu0 %v3180_v1 }
 0xd6f   :  { %2816 = vmatpush3.msra.mxu0 %v3716_v8 }
 0xd70   :  { %2817 = vmatprep.subr.mxu0 %v3180_v1 }
 0xd71   :  { %2818 = vmatpush3.msra.mxu0 %v3720_v21 }
 0xd72   :  { %2819 = vmatprep.subr.mxu0 %v3180_v1 }
 0xd73   :  { %2820 = vmatpush3.msra.mxu0 %v3724_v23 }
 0xd74   :  { %2821 = vmatprep.subr.mxu0 %v3180_v1 }
 0xd75   :  { %2822 = vmatpush3.msra.mxu0 %v3728_v26 }
 0xd76   :  { %2823 = vmatprep.subr.mxu0 %v3180_v1 }
 0xd77   :  { %2824 = vmatpush3.msra.mxu0 %v3732_v27 }
 0xd78   :  { %2825 = vmatprep.subr.mxu0 %v3180_v1 }
 0xd79   :  { %2826 = vmatpush3.msra.mxu0 %v3736_v28 }
 0xd7a   :  { %2827 = vmatprep.subr.mxu0 %v3180_v1 }
 0xd7b   :  { %2828 = vmatpush3.msra.mxu0 %v3740_v29 }
 0xd7c   :  { %2829 = vmatprep.subr.mxu0 %v3180_v1 }
 0xd7d   :  { %2830 = vmatpush3.msra.mxu0 %v3744_v30 }
 0xd7e   :  { %2831 = vmatprep.subr.mxu0 %v3180_v1 }
 0xd7f   :  { %2832 = vmatpush3.msra.mxu0 %v3748_v31 }
 0xd80   :  { %2833 = vmatprep.subr.mxu0 %v3180_v1 }
 0xd81   :  { %2834 = vmatpush3.msra.mxu0 %v3752_v32 }
 0xd82   :  { %2835 = vmatprep.subr.mxu0 %v3180_v1 }
 0xd83   :  { %2836 = vmatpush3.msra.mxu0 %v3756_v33 }
 0xd84   :  { %2875 = vmatprep.subr.mxu0 %v3180_v1 }
 0xe24   :  { %v1412_v41 = vpop.f32.mrf.mxu0 }
 0xe25   :  { %v1413_v44 = vadd.f32 %v3847_v50, %v1412_v41 }
 0xe26   :  { %v2769_v45 = vpop.f32.mrf.mxu0 }
 0xe27   :  { %v1416_v46 = vadd.f32 %v1413_v44, %v1110_v43 }
 0xe29   :  { %v1998_v47 = vmul.f32 -1.442695, %v1416_v46 }
 0xe2b   :  { %3050 = vpow2.f32 %v1998_v47 }
 0xe38   :  { %v3051_v49 = vpop.eup %3050 }
 0xe39   :  { %v1420_v54 = vadd.f32 1.0, %v3051_v49 }
 0xe3b   :  { %3052 = vrcp.f32 %v1420_v54 }
 0xe48   :  { %v3053_v55 = vpop.eup %3052 }
 0xe49   :  { %1425 = vrot.lane.b32.xlu1 %v3053_v55, %s3183_s16  ;;  %1423 = vrot.lane.b32.xlu0 %v3053_v55, %s3182_s12 }
 0xebb   :  { %v1424_v56 = vpop.permute.xlu0 %1423  ;;  %v1426_v61 = vpop.permute.xlu1 %1425 }
 0xebc   :  { %v1427_v57 = vmul.f32 %v1424_v56, %v1413_v44 }
 0xebe   :  { %v1428_v58 = vadd.f32 %v1427_v57, %v1110_v43  ;;  %v1130_v57 = vadd.f32 %v3852_v52, %v3905_v4 }
 0xec0   :  { %3054 = vtanh.f32 %v1428_v58 }
 0xecd   :  { %v3055_v59 = vpop.eup %3054 }
 0xece   :  { %v1430_v60 = vsub.f32 %v1344_v40, %v3055_v59 }
 0xed0   :  { %v1431_v48 = vmul.f32 %v1430_v60, %v1426_v61 }
 0xed2   :  { %v1432_v62 = vadd.f32 %v3055_v59, %v1431_v48 }
 0xed4   :  { %2803 = vmatmul.mubr.f32.vlgmr.msra.gmra.mxu1 %v1432_v62 }
 0xed5   :  { %2841 = vmatpush3.msra.mxu1 %v3697_v0  ;;  %2872 = vmatprep.mubr.msk.f32.mxu1 %vm3181_vm0, %v3180_v1 }
 0xed6   :  { %2842 = vmatprep.subr.mxu1 %v3180_v1 }
 0xed7   :  { %2843 = vmatpush3.msra.mxu1 %v3700_v7 }
 0xed8   :  { %2844 = vmatprep.subr.mxu1 %v3180_v1 }
 0xed9   :  { %2845 = vmatpush3.msra.mxu1 %v3704_v22 }
 0xeda   :  { %2846 = vmatprep.subr.mxu1 %v3180_v1 }
 0xedb   :  { %2847 = vmatpush3.msra.mxu1 %v3708_v24 }
 0xedc   :  { %2848 = vmatprep.subr.mxu1 %v3180_v1 }
 0xedd   :  { %2849 = vmatpush3.msra.mxu1 %v3712_v53 }
 0xede   :  { %2850 = vmatprep.subr.mxu1 %v3180_v1 }
 0xedf   :  { %2851 = vmatpush3.msra.mxu1 %v3716_v8 }
 0xee0   :  { %2852 = vmatprep.subr.mxu1 %v3180_v1 }
 0xee1   :  { %2853 = vmatpush3.msra.mxu1 %v3720_v21 }
 0xee2   :  { %2854 = vmatprep.subr.mxu1 %v3180_v1 }
 0xee3   :  { %2855 = vmatpush3.msra.mxu1 %v3724_v23 }
 0xee4   :  { %2856 = vmatprep.subr.mxu1 %v3180_v1 }
 0xee5   :  { %2857 = vmatpush3.msra.mxu1 %v3728_v26 }
 0xee6   :  { %2858 = vmatprep.subr.mxu1 %v3180_v1 }
 0xee7   :  { %2859 = vmatpush3.msra.mxu1 %v3732_v27 }
 0xee8   :  { %2860 = vmatprep.subr.mxu1 %v3180_v1 }
 0xee9   :  { %2861 = vmatpush3.msra.mxu1 %v3736_v28 }
 0xeea   :  { %2862 = vmatprep.subr.mxu1 %v3180_v1 }
 0xeeb   :  { %2863 = vmatpush3.msra.mxu1 %v3740_v29 }
 0xeec   :  { %2864 = vmatprep.subr.mxu1 %v3180_v1 }
 0xeed   :  { %2865 = vmatpush3.msra.mxu1 %v3744_v30 }
 0xeee   :  { %2866 = vmatprep.subr.mxu1 %v3180_v1 }
 0xeef   :  { %2867 = vmatpush3.msra.mxu1 %v3748_v31 }
 0xef0   :  { %2868 = vmatprep.subr.mxu1 %v3180_v1 }
 0xef1   :  { %2869 = vmatpush3.msra.mxu1 %v3752_v32 }
 0xef2   :  { %2870 = vmatprep.subr.mxu1 %v3180_v1 }
 0xef3   :  { %2871 = vmatpush3.msra.mxu1 %v3756_v33 }
 0xef4   :  { %2910 = vmatprep.subr.mxu1 %v3180_v1 }
 0xf94   :  { %v1500_v63 = vpop.f32.mrf.mxu1 }
 0xf95   :  { %v1501_v6 = vadd.f32 %v3847_v50, %v1500_v63 }
 0xf96   :  { %v2804_v42 = vpop.f32.mrf.mxu1 }
 0xf97   :  { %v1504_v51 = vadd.f32 %v1501_v6, %v1115_v25 }
 0xf99   :  { %v1999_v35 = vmul.f32 -1.442695, %v1504_v51 }
 0xf9b   :  { %3056 = vpow2.f32 %v1999_v35 }
 0xfa8   :  { %v3057_v5 = vpop.eup %3056 }
 0xfa9   :  { %v1508_v9 = vadd.f32 1.0, %v3057_v5 }
 0xfab   :  { %3058 = vrcp.f32 %v1508_v9 }
 0xfb8   :  { %v3059_v10 = vpop.eup %3058 }
 0xfb9   :  { %1513 = vrot.lane.b32.xlu1 %v3059_v10, %s3183_s16  ;;  %1511 = vrot.lane.b32.xlu0 %v3059_v10, %s3182_s12  ;;  %v1888_v10 = vld [vmem:[#allocation10 + $0x78] sm:$0xff] }
0x102b   :  { %v1512_v11 = vpop.permute.xlu0 %1511  ;;  %v1514_v15 = vpop.permute.xlu1 %1513 }
0x102c   :  { %v1515_v12 = vmul.f32 %v1512_v11, %v1501_v6  ;;  %v1887_v11 = vld [vmem:[#allocation10 + $0x70] sm:$0xff] }
0x102e   :  { %v1516_v13 = vadd.f32 %v1515_v12, %v1115_v25  ;;  %v1886_v12 = vld [vmem:[#allocation10 + $0x68] sm:$0xff] }
0x1030   :  { %3060 = vtanh.f32 %v1516_v13  ;;  %v1885_v13 = vld [vmem:[#allocation10 + $0x60] sm:$0xff] }
0x103d   :  { %v3061_v14 = vpop.eup %3060 }
0x103e   :  { %v1518_v34 = vsub.f32 %v1432_v62, %v3061_v14 }
0x1040   :  { %v1519_v16 = vmul.f32 %v1518_v34, %v1514_v15  ;;  %v1135_v34 = vadd.f32 %v3903_v3, %v3852_v52  ;;  %v1878_v3 = vld [vmem:[#allocation10 + $0x28] sm:$0xff] }
0x1042   :  { %v1520_v17 = vadd.f32 %v3061_v14, %v1519_v16 }
0x1044   :  { %2838 = vmatmul.mubr.f32.vlgmr.msra.gmra.mxu0 %v1520_v17 }
0x1045   :  { %2876 = vmatpush3.msra.mxu0 %v3697_v0  ;;  %2907 = vmatprep.mubr.msk.f32.mxu0 %vm3181_vm0, %v3180_v1 }
0x1046   :  { %2877 = vmatprep.subr.mxu0 %v3180_v1 }
0x1047   :  { %2878 = vmatpush3.msra.mxu0 %v3700_v7 }
0x1048   :  { %2879 = vmatprep.subr.mxu0 %v3180_v1 }
0x1049   :  { %2880 = vmatpush3.msra.mxu0 %v3704_v22 }
0x104a   :  { %2881 = vmatprep.subr.mxu0 %v3180_v1 }
0x104b   :  { %2882 = vmatpush3.msra.mxu0 %v3708_v24 }
0x104c   :  { %2883 = vmatprep.subr.mxu0 %v3180_v1 }
0x104d   :  { %2884 = vmatpush3.msra.mxu0 %v3712_v53 }
0x104e   :  { %2885 = vmatprep.subr.mxu0 %v3180_v1 }
0x104f   :  { %2886 = vmatpush3.msra.mxu0 %v3716_v8 }
0x1050   :  { %2887 = vmatprep.subr.mxu0 %v3180_v1 }
0x1051   :  { %2888 = vmatpush3.msra.mxu0 %v3720_v21 }
0x1052   :  { %2889 = vmatprep.subr.mxu0 %v3180_v1 }
0x1053   :  { %2890 = vmatpush3.msra.mxu0 %v3724_v23 }
0x1054   :  { %2891 = vmatprep.subr.mxu0 %v3180_v1 }
0x1055   :  { %2892 = vmatpush3.msra.mxu0 %v3728_v26 }
0x1056   :  { %2893 = vmatprep.subr.mxu0 %v3180_v1 }
0x1057   :  { %2894 = vmatpush3.msra.mxu0 %v3732_v27 }
0x1058   :  { %2895 = vmatprep.subr.mxu0 %v3180_v1 }
0x1059   :  { %2896 = vmatpush3.msra.mxu0 %v3736_v28 }
0x105a   :  { %2897 = vmatprep.subr.mxu0 %v3180_v1 }
0x105b   :  { %2898 = vmatpush3.msra.mxu0 %v3740_v29 }
0x105c   :  { %2899 = vmatprep.subr.mxu0 %v3180_v1 }
0x105d   :  { %2900 = vmatpush3.msra.mxu0 %v3744_v30 }
0x105e   :  { %2901 = vmatprep.subr.mxu0 %v3180_v1 }
0x105f   :  { %2902 = vmatpush3.msra.mxu0 %v3748_v31 }
0x1060   :  { %2903 = vmatprep.subr.mxu0 %v3180_v1 }
0x1061   :  { %2904 = vmatpush3.msra.mxu0 %v3752_v32 }
0x1062   :  { %2905 = vmatprep.subr.mxu0 %v3180_v1 }
0x1063   :  { %2906 = vmatpush3.msra.mxu0 %v3756_v33 }
0x1064   :  { %2945 = vmatprep.subr.mxu0 %v3180_v1 }
0x1104   :  { %v1588_v18 = vpop.f32.mrf.mxu0 }
0x1105   :  { %v1589_v37 = vadd.f32 %v3847_v50, %v1588_v18 }
0x1106   :  { %v2839_v19 = vpop.f32.mrf.mxu0 }
0x1107   :  { %v1592_v38 = vadd.f32 %v1589_v37, %v1120_v20  ;;  %v1884_v19 = vld [vmem:[#allocation10 + $0x58] sm:$0xff] }
0x1109   :  { %v2000_v39 = vmul.f32 -1.442695, %v1592_v38  ;;  %v1883_v38 = vld [vmem:[#allocation10 + $0x50] sm:$0xff] }
0x110b   :  { %3062 = vpow2.f32 %v2000_v39  ;;  %v1882_v39 = vld [vmem:[#allocation10 + $0x48] sm:$0xff] }
0x1118   :  { %v3063_v40 = vpop.eup %3062 }
0x1119   :  { %v1596_v41 = vadd.f32 1.0, %v3063_v40  ;;  %v1881_v40 = vld [vmem:[#allocation10 + $0x40] sm:$0xff] }
0x111b   :  { %3064 = vrcp.f32 %v1596_v41 }
0x1128   :  { %v3065_v43 = vpop.eup %3064 }
0x1129   :  { %1601 = vrot.lane.b32.xlu1 %v3065_v43, %s3183_s16  ;;  %1599 = vrot.lane.b32.xlu0 %v3065_v43, %s3182_s12  ;;  %v1877_v43 = vld [vmem:[#allocation10 + $0x20] sm:$0xff] }
0x119b   :  { %v1600_v44 = vpop.permute.xlu0 %1599  ;;  %v1602_v49 = vpop.permute.xlu1 %1601 }
0x119c   :  { %v1603_v45 = vmul.f32 %v1600_v44, %v1589_v37  ;;  %v1876_v44 = vld [vmem:[#allocation10 + $0x18] sm:$0xff] }
0x119e   :  { %v1604_v46 = vadd.f32 %v1603_v45, %v1120_v20  ;;  %v1875_v45 = vld [vmem:[#allocation10 + $0x10] sm:$0xff] }
0x11a0   :  { %3066 = vtanh.f32 %v1604_v46  ;;  %v1874_v46 = vld [vmem:[#allocation10 + $0x8] sm:$0xff] }
0x11ad   :  { %v3067_v47 = vpop.eup %3066 }
0x11ae   :  { %v1606_v2 = vsub.f32 %v1520_v17, %v3067_v47 }
0x11b0   :  { %v1607_v54 = vmul.f32 %v1606_v2, %v1602_v49 }
0x11b2   :  { %v1608_v55 = vadd.f32 %v3067_v47, %v1607_v54  ;;  %v1873_v47 = vld [vmem:[#allocation10] sm:$0xff] }
0x11b4   :  { %2873 = vmatmul.mubr.f32.vlgmr.msra.gmra.mxu1 %v1608_v55 }
0x11b5   :  { %2911 = vmatpush3.msra.mxu1 %v3697_v0  ;;  %2942 = vmatprep.mubr.msk.f32.mxu1 %vm3181_vm0, %v3180_v1 }
0x11b6   :  { %2912 = vmatprep.subr.mxu1 %v3180_v1 }
0x11b7   :  { %2913 = vmatpush3.msra.mxu1 %v3700_v7  ;;  %v1125_v7 = vadd.f32 %v3899_v36, %v3852_v52  ;;  %v1879_v52 = vld [vmem:[#allocation10 + $0x30] sm:$0xff] }
0x11b8   :  { %2914 = vmatprep.subr.mxu1 %v3180_v1 }
0x11b9   :  { %2915 = vmatpush3.msra.mxu1 %v3704_v22 }
0x11ba   :  { %2916 = vmatprep.subr.mxu1 %v3180_v1 }
0x11bb   :  { %2917 = vmatpush3.msra.mxu1 %v3708_v24 }
0x11bc   :  { %2918 = vmatprep.subr.mxu1 %v3180_v1 }
0x11bd   :  { %2919 = vmatpush3.msra.mxu1 %v3712_v53 }
0x11be   :  { %2920 = vmatprep.subr.mxu1 %v3180_v1 }
0x11bf   :  { %2921 = vmatpush3.msra.mxu1 %v3716_v8 }
0x11c0   :  { %2922 = vmatprep.subr.mxu1 %v3180_v1 }
0x11c1   :  { %2923 = vmatpush3.msra.mxu1 %v3720_v21 }
0x11c2   :  { %2924 = vmatprep.subr.mxu1 %v3180_v1 }
0x11c3   :  { %2925 = vmatpush3.msra.mxu1 %v3724_v23 }
0x11c4   :  { %2926 = vmatprep.subr.mxu1 %v3180_v1 }
0x11c5   :  { %2927 = vmatpush3.msra.mxu1 %v3728_v26 }
0x11c6   :  { %2928 = vmatprep.subr.mxu1 %v3180_v1 }
0x11c7   :  { %2929 = vmatpush3.msra.mxu1 %v3732_v27 }
0x11c8   :  { %2930 = vmatprep.subr.mxu1 %v3180_v1 }
0x11c9   :  { %2931 = vmatpush3.msra.mxu1 %v3736_v28 }
0x11ca   :  { %2932 = vmatprep.subr.mxu1 %v3180_v1 }
0x11cb   :  { %2933 = vmatpush3.msra.mxu1 %v3740_v29 }
0x11cc   :  { %2934 = vmatprep.subr.mxu1 %v3180_v1 }
0x11cd   :  { %2935 = vmatpush3.msra.mxu1 %v3744_v30 }
0x11ce   :  { %2936 = vmatprep.subr.mxu1 %v3180_v1 }
0x11cf   :  { %2937 = vmatpush3.msra.mxu1 %v3748_v31 }
0x11d0   :  { %2938 = vmatprep.subr.mxu1 %v3180_v1 }
0x11d1   :  { %2939 = vmatpush3.msra.mxu1 %v3752_v32 }
0x11d2   :  { %2940 = vmatprep.subr.mxu1 %v3180_v1 }
0x11d3   :  { %2941 = vmatpush3.msra.mxu1 %v3756_v33 }
0x1274   :  { %v1676_v0 = vpop.f32.mrf.mxu1 }
0x1275   :  { %v1677_v22 = vadd.f32 %v3847_v50, %v1676_v0 }
0x1276   :  { %v2874_v24 = vpop.f32.mrf.mxu1 }
0x1277   :  { %v1680_v53 = vadd.f32 %v1677_v22, %v1125_v7 }
0x1279   :  { %v2001_v8 = vmul.f32 -1.442695, %v1680_v53  ;;  %v2004_v53 = vld [vmem:[#allocation4] ss:$0 sm:$0xff] }
0x127b   :  { %3068 = vpow2.f32 %v2001_v8 }
0x1288   :  { %v3069_v21 = vpop.eup %3068 }
0x1289   :  { %v1684_v23 = vadd.f32 1.0, %v3069_v21 }
0x128b   :  { %3070 = vrcp.f32 %v1684_v23 }
0x1298   :  { %v3071_v26 = vpop.eup %3070 }
0x1299   :  { %1689 = vrot.lane.b32.xlu1 %v3071_v26, %s3183_s16  ;;  %1687 = vrot.lane.b32.xlu0 %v3071_v26, %s3182_s12 }
0x130b   :  { %v1688_v27 = vpop.permute.xlu0 %1687  ;;  %v1690_v32 = vpop.permute.xlu1 %1689 }
0x130c   :  { %v1691_v28 = vmul.f32 %v1688_v27, %v1677_v22 }
0x130e   :  { %v1692_v29 = vadd.f32 %v1691_v28, %v1125_v7 }
0x1310   :  { %3072 = vtanh.f32 %v1692_v29 }
0x131d   :  { %v3073_v30 = vpop.eup %3072 }
0x131e   :  { %v1694_v31 = vsub.f32 %v1608_v55, %v3073_v30 }
0x1320   :  { %v1695_v33 = vmul.f32 %v1694_v31, %v1690_v32 }
0x1322   :  { %v1696_v36 = vadd.f32 %v3073_v30, %v1695_v33 }
0x1324   :  { %2908 = vmatmul.mubr.f32.vlgmr.msra.gmra.mxu0 %v1696_v36 }
0x1325   :  { %2977 = vmatprep.mubr.msk.f32.mxu0 %vm3181_vm0, %v3180_v1  ;;  %2946 = vmatpush3.msra.mxu0 %v1888_v10 }
0x1326   :  { %2947 = vmatprep.subr.mxu0 %v3180_v1 }
0x1327   :  { %2948 = vmatpush3.msra.mxu0 %v1887_v11 }
0x1328   :  { %2949 = vmatprep.subr.mxu0 %v3180_v1 }
0x1329   :  { %2950 = vmatpush3.msra.mxu0 %v1886_v12 }
0x132a   :  { %2951 = vmatprep.subr.mxu0 %v3180_v1 }
0x132b   :  { %2952 = vmatpush3.msra.mxu0 %v1885_v13 }
0x132c   :  { %2953 = vmatprep.subr.mxu0 %v3180_v1 }
0x132d   :  { %2954 = vmatpush3.msra.mxu0 %v1884_v19 }
0x132e   :  { %2955 = vmatprep.subr.mxu0 %v3180_v1 }
0x132f   :  { %2956 = vmatpush3.msra.mxu0 %v1883_v38 }
0x1330   :  { %2957 = vmatprep.subr.mxu0 %v3180_v1 }
0x1331   :  { %2958 = vmatpush3.msra.mxu0 %v1882_v39 }
0x1332   :  { %2959 = vmatprep.subr.mxu0 %v3180_v1 }
0x1333   :  { %2960 = vmatpush3.msra.mxu0 %v1881_v40 }
0x1334   :  { %2961 = vmatprep.subr.mxu0 %v3180_v1 }
0x13e4   :  { %v1764_v56 = vpop.f32.mrf.mxu0 }
0x13e5   :  { %v1765_v58 = vadd.f32 %v3847_v50, %v1764_v56 }
0x13e6   :  { %v2909_v59 = vpop.f32.mrf.mxu0 }
0x13e7   :  { %v1768_v60 = vadd.f32 %v1765_v58, %v1130_v57 }
0x13e9   :  { %v2002_v61 = vmul.f32 -1.442695, %v1768_v60 }
0x13eb   :  { %3074 = vpow2.f32 %v2002_v61 }
0x13f8   :  { %v3075_v48 = vpop.eup %3074 }
0x13f9   :  { %v1772_v62 = vadd.f32 1.0, %v3075_v48 }
0x13fb   :  { %3076 = vrcp.f32 %v1772_v62 }
0x1408   :  { %v3077_v63 = vpop.eup %3076 }
0x1409   :  { %1777 = vrot.lane.b32.xlu1 %v3077_v63, %s3183_s16  ;;  %1775 = vrot.lane.b32.xlu0 %v3077_v63, %s3182_s12 }
0x147b   :  { %v1776_v25 = vpop.permute.xlu0 %1775  ;;  %v1778_v35 = vpop.permute.xlu1 %1777 }
0x147c   :  { %v1779_v6 = vmul.f32 %v1776_v25, %v1765_v58 }
0x147e   :  { %v1780_v42 = vadd.f32 %v1779_v6, %v1130_v57 }
0x1480   :  { %3078 = vtanh.f32 %v1780_v42 }
0x148d   :  { %v3079_v51 = vpop.eup %3078 }
0x148e   :  { %v1782_v4 = vsub.f32 %v1696_v36, %v3079_v51 }
0x1490   :  { %v1783_v5 = vmul.f32 %v1782_v4, %v1778_v35 }
0x1492   :  { %v4073_v9 = vadd.f32 %v3079_v51, %v1783_v5 }
0x1494   :  { %2943 = vmatmul.mubr.f32.vlgmr.msra.gmra.mxu1 %v4073_v9 }
0x1554   :  { %v1852_v14 = vpop.f32.mrf.mxu1 }
0x1555   :  { %v1853_v15 = vadd.f32 %v3847_v50, %v1852_v14  ;;  %v1880_v50 = vld [vmem:[#allocation10 + $0x38] sm:$0xff] }
0x1556   :  { %v2944_v16 = vpop.f32.mrf.mxu1  ;;  %2962 = vmatpush3.msra.mxu0 %v1880_v50 }
0x1557   :  { %v1856_v17 = vadd.f32 %v1853_v15, %v1135_v34  ;;  %2963 = vmatprep.subr.mxu0 %v3180_v1 }
0x1558   :  { %2964 = vmatpush3.msra.mxu0 %v1879_v52 }
0x1559   :  { %v2003_v18 = vmul.f32 -1.442695, %v1856_v17  ;;  %2965 = vmatprep.subr.mxu0 %v3180_v1 }
0x155a   :  { %2966 = vmatpush3.msra.mxu0 %v1878_v3 }
0x155b   :  { %3080 = vpow2.f32 %v2003_v18  ;;  %2967 = vmatprep.subr.mxu0 %v3180_v1 }
0x155c   :  { %2968 = vmatpush3.msra.mxu0 %v1877_v43 }
0x155d   :  { %2969 = vmatprep.subr.mxu0 %v3180_v1 }
0x155e   :  { %2970 = vmatpush3.msra.mxu0 %v1876_v44 }
0x155f   :  { %2971 = vmatprep.subr.mxu0 %v3180_v1 }
0x1560   :  { %2972 = vmatpush3.msra.mxu0 %v1875_v45 }
0x1561   :  { %2973 = vmatprep.subr.mxu0 %v3180_v1 }
0x1562   :  { %2974 = vmatpush3.msra.mxu0 %v1874_v46 }
0x1563   :  { %2975 = vmatprep.subr.mxu0 %v3180_v1 }
0x1564   :  { %2976 = vmatpush3.msra.mxu0 %v1873_v47 }
0x1568   :  { %v3081_v20 = vpop.eup %3080 }
0x1569   :  { %v1860_v37 = vadd.f32 1.0, %v3081_v20 }
0x156b   :  { %3082 = vrcp.f32 %v1860_v37 }
0x1578   :  { %v3083_v41 = vpop.eup %3082 }
0x1579   :  { %1865 = vrot.lane.b32.xlu1 %v3083_v41, %s3183_s16  ;;  %1863 = vrot.lane.b32.xlu0 %v3083_v41, %s3182_s12 }
0x15eb   :  { %v1864_v2 = vpop.permute.xlu0 %1863  ;;  %v1866_v7 = vpop.permute.xlu1 %1865 }
0x15ec   :  { %v1867_v49 = vmul.f32 %v1864_v2, %v1853_v15 }
0x15ee   :  { %v1868_v54 = vadd.f32 %v1867_v49, %v1135_v34 }
0x15f0   :  { %3084 = vtanh.f32 %v1868_v54 }
0x15fd   :  { %v3085_v55 = vpop.eup %3084 }
0x15fe   :  { %v1870_v0 = vsub.f32 %v4073_v9, %v3085_v55 }
0x1600   :  { %v1871_v22 = vmul.f32 %v1870_v0, %v1866_v7 }
0x1602   :  { %v1872_v24 = vadd.f32 %v3085_v55, %v1871_v22 }
0x1604   :  { %2978 = vmatmul.mubr.f32.vlgmr.msra.gmra.mxu0 %v1872_v24 }
0x16c4   :  { %v1962_v8 = vpop.f32.mrf.mxu0 }
0x16c5   :  { %v1963_v21 = vadd.f32 %v2004_v53, %v1962_v8 }
0x16c6   :  { %v2979_v23 = vpop.f32.mrf.mxu0 }
0x16c7   :  { %1967 = vst.msk [vmem:[%s4111_s11] sm:$0xff] %vm1966_vm3, %v1963_v21 }
0x16c8   :  { %1972 = vsyncpa [#allocation6], 1 }
0x16c9   :  { %1973 = vsyncpa [#allocation8], 1 }
0x16ca   :  { %1974 = vsyncpa [#allocation11], 1 }

</bundles_post_ra>
